<compile_context>
chip_gen: v7x
topology: tpu7x:2x2x1
jax: 0.10.0
libtpu: 0.0.40
codegen_flags: <defaults>
</compile_context>

<pallas_src>
import functools

import jax
import jax.numpy as jnp
from jax.experimental import pallas as pl
from jax.experimental.pallas import tpu as pltpu

Z_DIM = 100
H1, H2, H3 = 256, 512, 1024


def _round_up(n, m):
    return ((n + m - 1) // m) * m


def _leaky_relu(x, slope=0.2):
    return jnp.where(x > 0, x, slope * x)


def generator_kernel(x_ref,
                     w1_ref, b1_ref,
                     w2_ref, b2_ref,
                     w3_ref, b3_ref,
                     w4_ref, b4_ref,
                     o_ref):
    # Four fused layers: bf16 MXU matmuls with f32 accumulation, f32 bias add
    # + LeakyReLU / tanh on the VPU/EUP, re-cast to bf16 between layers.
    h = jnp.dot(x_ref[...], w1_ref[...], preferred_element_type=jnp.float32)
    h = _leaky_relu(h + b1_ref[...]).astype(jnp.bfloat16)

    h = jnp.dot(h, w2_ref[...], preferred_element_type=jnp.float32)
    h = _leaky_relu(h + b2_ref[...]).astype(jnp.bfloat16)

    h = jnp.dot(h, w3_ref[...], preferred_element_type=jnp.float32)
    h = _leaky_relu(h + b3_ref[...]).astype(jnp.bfloat16)

    h = jnp.dot(h, w4_ref[...], preferred_element_type=jnp.float32)
    o_ref[...] = jnp.tanh(h + b4_ref[...]).astype(o_ref.dtype)


@functools.partial(jax.jit, static_argnames=("tile_b",))
def generator_forward(x, params, *, tile_b=256):
    """x: [B, z_dim] float32 -> [B, img_dim] float32 in (-1, 1)."""
    (w1, b1), (w2, b2), (w3, b3), (w4, b4) = params
    B, z_dim = x.shape
    img_dim = w4.shape[1]

    # Lane / MXU friendly padding: contraction of layer 1 and output lanes of
    # layer 4 rounded up to multiples of 128.  Extra rows/cols are zero, so
    # semantics are unchanged (padded outputs are sliced away).
    z_pad = _round_up(z_dim, 128)
    img_pad = _round_up(img_dim, 128)

    x_p = jnp.pad(x, ((0, 0), (0, z_pad - z_dim)))
    w1_p = jnp.pad(w1, ((0, z_pad - z_dim), (0, 0)))
    w4_p = jnp.pad(w4, ((0, 0), (0, img_pad - img_dim)))
    b4_p = jnp.pad(b4, ((0, 0), (0, img_pad - img_dim)))

    # Batch tiling: large tiles amortize per-step overhead and fill MXU rows;
    # tiny batches collapse to one sublane-aligned tile.
    tile_b = min(tile_b, _round_up(B, 8))
    b_pad = _round_up(B, tile_b)
    x_p = jnp.pad(x_p, ((0, b_pad - B), (0, 0)))

    # bf16 inputs to the MXU (accumulation stays f32 inside the kernel).
    x_p = x_p.astype(jnp.bfloat16)
    w1_p = w1_p.astype(jnp.bfloat16)
    w2_b = w2.astype(jnp.bfloat16)
    w3_b = w3.astype(jnp.bfloat16)
    w4_p = w4_p.astype(jnp.bfloat16)

    grid = (b_pad // tile_b,)

    def batch_spec(feat):
        return pl.BlockSpec((tile_b, feat), lambda i: (i, 0))

    def resident_spec(shape):
        return pl.BlockSpec(shape, lambda i: (0, 0))

    flops = 2 * b_pad * (z_pad * H1 + H1 * H2 + H2 * H3 + H3 * img_pad)
    bytes_accessed = (
        x_p.size * 2
        + (w1_p.size + w2_b.size + w3_b.size + w4_p.size) * 2
        + (b1.size + b2.size + b3.size + b4_p.size) * 4
        + b_pad * img_pad * 4
    )

    out = pl.pallas_call(
        generator_kernel,
        out_shape=jax.ShapeDtypeStruct((b_pad, img_pad), jnp.float32),
        grid=grid,
        in_specs=[
            batch_spec(z_pad),
            resident_spec(w1_p.shape), resident_spec(b1.shape),
            resident_spec(w2_b.shape), resident_spec(b2.shape),
            resident_spec(w3_b.shape), resident_spec(b3.shape),
            resident_spec(w4_p.shape), resident_spec(b4_p.shape),
        ],
        out_specs=batch_spec(img_pad),
        compiler_params=pltpu.CompilerParams(
            dimension_semantics=("parallel",),
        ),
        cost_estimate=pl.CostEstimate(
            flops=flops,
            transcendentals=b_pad * img_pad,
            bytes_accessed=bytes_accessed,
        ),
    )(x_p, w1_p, b1, w2_b, b2, w3_b, b3, w4_p, b4_p)

    return out[:B, :img_dim]


def init_params(key, z_dim, img_dim):
    """Deterministic init mimicking nn.Linear default: U(-1/sqrt(fan_in), +)."""
    dims = [(z_dim, H1), (H1, H2), (H2, H3), (H3, img_dim)]
    params = []
    for (fan_in, fan_out) in dims:
        key, kw, kb = jax.random.split(key, 3)
        bound = 1.0 / jnp.sqrt(fan_in)
        w = jax.random.uniform(kw, (fan_in, fan_out), jnp.float32, -bound, bound)
        b = jax.random.uniform(kb, (1, fan_out), jnp.float32, -bound, bound)
        params.append((w, b))
    return params


def reference_forward_f32(x, params):
    (w1, b1), (w2, b2), (w3, b3), (w4, b4) = params
    h = _leaky_relu(x @ w1 + b1)
    h = _leaky_relu(h @ w2 + b2)
    h = _leaky_relu(h @ w3 + b3)
    return jnp.tanh(h @ w4 + b4)


def reference_forward_bf16(x, params):
    """Emulates the kernel's bf16-input / f32-accumulate arithmetic."""
    (w1, b1), (w2, b2), (w3, b3), (w4, b4) = params

    def layer(h, w, b):
        return jnp.dot(h.astype(jnp.bfloat16), w.astype(jnp.bfloat16),
                       preferred_element_type=jnp.float32) + b

    h = _leaky_relu(layer(x, w1, b1))
    h = _leaky_relu(layer(h, w2, b2))
    h = _leaky_relu(layer(h, w3, b3))
    return jnp.tanh(layer(h, w4, b4))


if __name__ == "__main__":
    key = jax.random.PRNGKey(0)
    kx, kp = jax.random.split(key)

    batch = 8
    img_dim = 64  # e.g. an 8x8 synthetic image, flattened

    x = jax.random.normal(kx, (batch, Z_DIM), jnp.float32)
    params = init_params(kp, Z_DIM, img_dim)

    out = jax.block_until_ready(generator_forward(x, params))

    ref_bf16 = reference_forward_bf16(x, params)
    ref_f32 = reference_forward_f32(x, params)

    assert out.shape == (batch, img_dim)
    # Tight check vs the same bf16-input arithmetic the kernel uses.
    assert jnp.allclose(out, ref_bf16, atol=2e-2, rtol=2e-2)
    # Loose check vs the pure-f32 PyTorch-equivalent forward.
    assert jnp.allclose(out, ref_f32, atol=6e-2, rtol=6e-2)

    print("KERNEL_OK")
</pallas_src>

<mosaic_0001>
module attributes {stable_mosaic.version = 11 : i64} {
  func.func @generator_kernel(%arg0: i32, %arg1: memref<8x128xbf16, #tpu.memory_space<vmem>>, %arg2: memref<128x256xbf16, #tpu.memory_space<vmem>>, %arg3: memref<1x256xf32, #tpu.memory_space<vmem>>, %arg4: memref<256x512xbf16, #tpu.memory_space<vmem>>, %arg5: memref<1x512xf32, #tpu.memory_space<vmem>>, %arg6: memref<512x1024xbf16, #tpu.memory_space<vmem>>, %arg7: memref<1x1024xf32, #tpu.memory_space<vmem>>, %arg8: memref<1024x128xbf16, #tpu.memory_space<vmem>>, %arg9: memref<1x128xf32, #tpu.memory_space<vmem>>, %arg10: memref<8x128xf32, #tpu.memory_space<vmem>>) attributes {dimension_semantics = [#tpu.dimension_semantics<parallel>], iteration_bounds = array<i64: 1>, scalar_prefetch = 0 : i64, scratch_operands = 0 : i64, tpu.core_type = #tpu.core_type<tc>, window_params = [{transform_indices = @transform_0, window_bounds = array<i64: 8, 128>}, {pipeline_mode = #tpu.pipeline_mode<synchronous>, transform_indices = @transform_1, window_bounds = array<i64: 128, 256>}, {pipeline_mode = #tpu.pipeline_mode<synchronous>, transform_indices = @transform_2, window_bounds = array<i64: 1, 256>}, {pipeline_mode = #tpu.pipeline_mode<synchronous>, transform_indices = @transform_3, window_bounds = array<i64: 256, 512>}, {pipeline_mode = #tpu.pipeline_mode<synchronous>, transform_indices = @transform_4, window_bounds = array<i64: 1, 512>}, {pipeline_mode = #tpu.pipeline_mode<synchronous>, transform_indices = @transform_5, window_bounds = array<i64: 512, 1024>}, {pipeline_mode = #tpu.pipeline_mode<synchronous>, transform_indices = @transform_6, window_bounds = array<i64: 1, 1024>}, {pipeline_mode = #tpu.pipeline_mode<synchronous>, transform_indices = @transform_7, window_bounds = array<i64: 1024, 128>}, {pipeline_mode = #tpu.pipeline_mode<synchronous>, transform_indices = @transform_8, window_bounds = array<i64: 1, 128>}, {transform_indices = @transform_9, window_bounds = array<i64: 8, 128>}]} {
    %c0 = arith.constant 0 : index
    %c0_0 = arith.constant 0 : index
    %0 = vector.load %arg1[%c0, %c0_0] : memref<8x128xbf16, #tpu.memory_space<vmem>>, vector<8x128xbf16>
    %c0_1 = arith.constant 0 : index
    %c0_2 = arith.constant 0 : index
    %1 = vector.load %arg2[%c0_1, %c0_2] : memref<128x256xbf16, #tpu.memory_space<vmem>>, vector<128x256xbf16>
    %cst = arith.constant dense<0.000000e+00> : vector<8x256xf32>
    %2 = tpu.matmul %0, %1, %cst {dimension_numbers = #tpu.dot_dimension_numbers<[1], [0], [0], [1], [0, 0, 1, 1], [], []>} : vector<8x128xbf16>, vector<128x256xbf16>, vector<8x256xf32> -> vector<8x256xf32>
    %c0_3 = arith.constant 0 : index
    %c0_4 = arith.constant 0 : index
    %3 = vector.load %arg3[%c0_3, %c0_4] : memref<1x256xf32, #tpu.memory_space<vmem>>, vector<1x256xf32>
    %4 = vector.broadcast %3 : vector<1x256xf32> to vector<8x256xf32>
    %5 = arith.addf %2, %4 : vector<8x256xf32>
    %cst_5 = arith.constant 0.000000e+00 : f32
    %6 = vector.broadcast %cst_5 : f32 to vector<8x256xf32>
    %7 = arith.cmpf ogt, %5, %6 : vector<8x256xf32>
    %cst_6 = arith.constant 2.000000e-01 : f32
    %8 = vector.broadcast %cst_6 : f32 to vector<8x256xf32>
    %9 = arith.mulf %8, %5 : vector<8x256xf32>
    %10 = arith.select %7, %5, %9 : vector<8x256xi1>, vector<8x256xf32>
    %11 = arith.truncf %10 : vector<8x256xf32> to vector<8x256xbf16>
    %c0_7 = arith.constant 0 : index
    %c0_8 = arith.constant 0 : index
    %12 = vector.load %arg4[%c0_7, %c0_8] : memref<256x512xbf16, #tpu.memory_space<vmem>>, vector<256x512xbf16>
    %cst_9 = arith.constant dense<0.000000e+00> : vector<8x512xf32>
    %13 = tpu.matmul %11, %12, %cst_9 {dimension_numbers = #tpu.dot_dimension_numbers<[1], [0], [0], [1], [0, 0, 1, 1], [], []>} : vector<8x256xbf16>, vector<256x512xbf16>, vector<8x512xf32> -> vector<8x512xf32>
    %c0_10 = arith.constant 0 : index
    %c0_11 = arith.constant 0 : index
    %14 = vector.load %arg5[%c0_10, %c0_11] : memref<1x512xf32, #tpu.memory_space<vmem>>, vector<1x512xf32>
    %15 = vector.broadcast %14 : vector<1x512xf32> to vector<8x512xf32>
    %16 = arith.addf %13, %15 : vector<8x512xf32>
    %cst_12 = arith.constant 0.000000e+00 : f32
    %17 = vector.broadcast %cst_12 : f32 to vector<8x512xf32>
    %18 = arith.cmpf ogt, %16, %17 : vector<8x512xf32>
    %cst_13 = arith.constant 2.000000e-01 : f32
    %19 = vector.broadcast %cst_13 : f32 to vector<8x512xf32>
    %20 = arith.mulf %19, %16 : vector<8x512xf32>
    %21 = arith.select %18, %16, %20 : vector<8x512xi1>, vector<8x512xf32>
    %22 = arith.truncf %21 : vector<8x512xf32> to vector<8x512xbf16>
    %c0_14 = arith.constant 0 : index
    %c0_15 = arith.constant 0 : index
    %23 = vector.load %arg6[%c0_14, %c0_15] : memref<512x1024xbf16, #tpu.memory_space<vmem>>, vector<512x1024xbf16>
    %cst_16 = arith.constant dense<0.000000e+00> : vector<8x1024xf32>
    %24 = tpu.matmul %22, %23, %cst_16 {dimension_numbers = #tpu.dot_dimension_numbers<[1], [0], [0], [1], [0, 0, 1, 1], [], []>} : vector<8x512xbf16>, vector<512x1024xbf16>, vector<8x1024xf32> -> vector<8x1024xf32>
    %c0_17 = arith.constant 0 : index
    %c0_18 = arith.constant 0 : index
    %25 = vector.load %arg7[%c0_17, %c0_18] : memref<1x1024xf32, #tpu.memory_space<vmem>>, vector<1x1024xf32>
    %26 = vector.broadcast %25 : vector<1x1024xf32> to vector<8x1024xf32>
    %27 = arith.addf %24, %26 : vector<8x1024xf32>
    %cst_19 = arith.constant 0.000000e+00 : f32
    %28 = vector.broadcast %cst_19 : f32 to vector<8x1024xf32>
    %29 = arith.cmpf ogt, %27, %28 : vector<8x1024xf32>
    %cst_20 = arith.constant 2.000000e-01 : f32
    %30 = vector.broadcast %cst_20 : f32 to vector<8x1024xf32>
    %31 = arith.mulf %30, %27 : vector<8x1024xf32>
    %32 = arith.select %29, %27, %31 : vector<8x1024xi1>, vector<8x1024xf32>
    %33 = arith.truncf %32 : vector<8x1024xf32> to vector<8x1024xbf16>
    %c0_21 = arith.constant 0 : index
    %c0_22 = arith.constant 0 : index
    %34 = vector.load %arg8[%c0_21, %c0_22] : memref<1024x128xbf16, #tpu.memory_space<vmem>>, vector<1024x128xbf16>
    %cst_23 = arith.constant dense<0.000000e+00> : vector<8x128xf32>
    %35 = tpu.matmul %33, %34, %cst_23 {dimension_numbers = #tpu.dot_dimension_numbers<[1], [0], [0], [1], [0, 0, 1, 1], [], []>} : vector<8x1024xbf16>, vector<1024x128xbf16>, vector<8x128xf32> -> vector<8x128xf32>
    %c0_24 = arith.constant 0 : index
    %c0_25 = arith.constant 0 : index
    %36 = vector.load %arg9[%c0_24, %c0_25] : memref<1x128xf32, #tpu.memory_space<vmem>>, vector<1x128xf32>
    %37 = vector.broadcast %36 : vector<1x128xf32> to vector<8x128xf32>
    %38 = arith.addf %35, %37 : vector<8x128xf32>
    %39 = math.tanh %38 : vector<8x128xf32>
    %c0_26 = arith.constant 0 : index
    %c0_27 = arith.constant 0 : index
    %40 = vector.load %arg10[%c0_26, %c0_27] : memref<8x128xf32, #tpu.memory_space<vmem>>, vector<8x128xf32>
    tpu.vector_store %arg10[%c0_26, %c0_27], %39 {strides = array<i32>} : memref<8x128xf32, #tpu.memory_space<vmem>>, vector<8x128xf32>,
    return
  }
  func.func @transform_0(%arg0: i32) -> (i32, i32) {
    %c0_i32 = arith.constant 0 : i32
    %c0_i32_0 = arith.constant 0 : i32
    return %arg0, %c0_i32 : i32, i32
  }
  func.func @transform_1(%arg0: i32) -> (i32, i32) {
    %c0_i32 = arith.constant 0 : i32
    %c0_i32_0 = arith.constant 0 : i32
    %c0_i32_1 = arith.constant 0 : i32
    return %c0_i32, %c0_i32_0 : i32, i32
  }
  func.func @transform_2(%arg0: i32) -> (i32, i32) {
    %c0_i32 = arith.constant 0 : i32
    %c0_i32_0 = arith.constant 0 : i32
    %c0_i32_1 = arith.constant 0 : i32
    return %c0_i32, %c0_i32_0 : i32, i32
  }
  func.func @transform_3(%arg0: i32) -> (i32, i32) {
    %c0_i32 = arith.constant 0 : i32
    %c0_i32_0 = arith.constant 0 : i32
    %c0_i32_1 = arith.constant 0 : i32
    return %c0_i32, %c0_i32_0 : i32, i32
  }
  func.func @transform_4(%arg0: i32) -> (i32, i32) {
    %c0_i32 = arith.constant 0 : i32
    %c0_i32_0 = arith.constant 0 : i32
    %c0_i32_1 = arith.constant 0 : i32
    return %c0_i32, %c0_i32_0 : i32, i32
  }
  func.func @transform_5(%arg0: i32) -> (i32, i32) {
    %c0_i32 = arith.constant 0 : i32
    %c0_i32_0 = arith.constant 0 : i32
    %c0_i32_1 = arith.constant 0 : i32
    return %c0_i32, %c0_i32_0 : i32, i32
  }
  func.func @transform_6(%arg0: i32) -> (i32, i32) {
    %c0_i32 = arith.constant 0 : i32
    %c0_i32_0 = arith.constant 0 : i32
    %c0_i32_1 = arith.constant 0 : i32
    return %c0_i32, %c0_i32_0 : i32, i32
  }
  func.func @transform_7(%arg0: i32) -> (i32, i32) {
    %c0_i32 = arith.constant 0 : i32
    %c0_i32_0 = arith.constant 0 : i32
    %c0_i32_1 = arith.constant 0 : i32
    return %c0_i32, %c0_i32_0 : i32, i32
  }
  func.func @transform_8(%arg0: i32) -> (i32, i32) {
    %c0_i32 = arith.constant 0 : i32
    %c0_i32_0 = arith.constant 0 : i32
    %c0_i32_1 = arith.constant 0 : i32
    return %c0_i32, %c0_i32_0 : i32, i32
  }
  func.func @transform_9(%arg0: i32) -> (i32, i32) {
    %c0_i32 = arith.constant 0 : i32
    %c0_i32_0 = arith.constant 0 : i32
    return %arg0, %c0_i32 : i32, i32
  }
}

</mosaic_0001>

<bundles_post_ra>
// kernel: generator_forward.1
= control target key start
LH: loop header
LB: loop body
LE: loop exit
PB: predicated region body
PF: predicated region fallthrough
CT: control target
= control target key end

     0   :  { %v4054_v2 = vmov 0   ;;  %s5404_s0 = inlined_call_operand.vmem [shape: bf16[8,128], index: 0, kind: input, shape index: {}]   ;;  %s5405_s1 = inlined_call_operand.vmem [shape: bf16[128,256], index: 1, kind: input, shape index: {}]   ;;  %s5406_s2 = inlined_call_operand.vmem [shape: f32[1,256], index: 2, kind: input, shape index: {}]   ;;  %s5407_s3 = inlined_call_operand.vmem [shape: bf16[256,512], index: 3, kind: input, shape index: {}]   ;;  %s5408_s4 = inlined_call_operand.vmem [shape: f32[1,512], index: 4, kind: input, shape index: {}]   ;;  %s5409_s5 = inlined_call_operand.vmem [shape: bf16[512,1024], index: 5, kind: input, shape index: {}]   ;;  %s5410_s6 = inlined_call_operand.vmem [shape: f32[1,1024], index: 6, kind: input, shape index: {}]   ;;  %s5411_s7 = inlined_call_operand.vmem [shape: bf16[1024,128], index: 7, kind: input, shape index: {}]   ;;  %s5412_s8 = inlined_call_operand.vmem [shape: f32[1,128], index: 8, kind: input, shape index: {}]   ;;  %s5413_s9 = inlined_call_operand.hbm [shape: f32[8,128], index: 9, kind: output, shape index: {}]  }
   0x1   :  { %v3844_v0 = vld [vmem:[%s5405_s1 + $0x4] ss:$8 sps:$4 sm:$0xff]   ;;  %v3846_v1 = vld [vmem:[%s5405_s1] ss:$8 sps:$4 sm:$0xff]   ;;  %175 = vmatprep.mubr.bf16.mxu0 %v4054_v2  ;;  %v3847_v3 = vld [vmem:[%s5405_s1 + $0x14] ss:$8 sps:$4 sm:$0xff]  }
   0x2   :  { %143 = vmatprep.subr.bf16.mxu0 %v3844_v0  ;;  %v3849_v4 = vld [vmem:[%s5405_s1 + $0x10] ss:$8 sps:$4 sm:$0xff]   ;;  %v3850_v5 = vld [vmem:[%s5405_s1 + $0x24] ss:$8 sps:$4 sm:$0xff]   ;;  %v3852_v6 = vld [vmem:[%s5405_s1 + $0x20] ss:$8 sps:$4 sm:$0xff]  }
   0x3   :  { %144 = vmatpush1.bf16.msra.mxu0 %v3846_v1  ;;  %v3853_v7 = vld [vmem:[%s5405_s1 + $0x34] ss:$8 sps:$4 sm:$0xff]   ;;  %v3855_v8 = vld [vmem:[%s5405_s1 + $0x30] ss:$8 sps:$4 sm:$0xff]   ;;  %v3856_v10 = vld [vmem:[%s5405_s1 + $0x44] ss:$8 sps:$4 sm:$0xff]  }
   0x4   :  { %145 = vmatprep.subr.bf16.mxu0 %v3847_v3  ;;  %v3868_v9 = vld [vmem:[%s5407_s3 + $0x4] ss:$16 sps:$4 sm:$0xff]   ;;  %v3873_v11 = vld [vmem:[%s5407_s3] ss:$16 sps:$4 sm:$0xff]   ;;  %v3872_v26 = vld [vmem:[%s5407_s3 + $0xc] ss:$16 sps:$4 sm:$0xff]  }
   0x5   :  { %598 = vmatprep.subr.bf16.mxu1 %v3868_v9  ;;  %v3874_v12 = vld [vmem:[%s5407_s3 + $0x24] ss:$16 sps:$4 sm:$0xff]   ;;  %v3858_v13 = vld [vmem:[%s5405_s1 + $0x40] ss:$8 sps:$4 sm:$0xff]   ;;  %v3861_v17 = vld [vmem:[%s5405_s1 + $0x50] ss:$8 sps:$4 sm:$0xff]  }
   0x6   :  { %v3859_v14 = vld [vmem:[%s5405_s1 + $0x54] ss:$8 sps:$4 sm:$0xff]   ;;  %599 = vmatpush1.bf16.msra.mxu1 %v3873_v11  ;;  %v3879_v15 = vld [vmem:[%s5407_s3 + $0x20] ss:$16 sps:$4 sm:$0xff]   ;;  %v3862_v18 = vld [vmem:[%s5405_s1 + $0x64] ss:$8 sps:$4 sm:$0xff]  }
   0x7   :  { %146 = vmatpush1.bf16.msra.mxu0 %v3849_v4  ;;  %600 = vmatprep.subr.bf16.mxu1 %v3874_v12  ;;  %v3880_v16 = vld [vmem:[%s5407_s3 + $0x44] ss:$16 sps:$4 sm:$0xff]   ;;  %v3885_v19 = vld [vmem:[%s5407_s3 + $0x40] ss:$16 sps:$4 sm:$0xff]   ;;  %v3870_v30 = vld [vmem:[%s5407_s3 + $0x8] ss:$16 sps:$4 sm:$0xff]  }
   0x8   :  { %147 = vmatprep.subr.bf16.mxu0 %v3850_v5  ;;  %v3886_v20 = vld [vmem:[%s5407_s3 + $0x64] ss:$16 sps:$4 sm:$0xff]   ;;  %v3864_v21 = vld [vmem:[%s5405_s1 + $0x60] ss:$8 sps:$4 sm:$0xff]   ;;  %v3867_v25 = vld [vmem:[%s5405_s1 + $0x70] ss:$8 sps:$4 sm:$0xff]  }
   0x9   :  { %v3865_v22 = vld [vmem:[%s5405_s1 + $0x74] ss:$8 sps:$4 sm:$0xff]   ;;  %v3891_v23 = vld [vmem:[%s5407_s3 + $0x60] ss:$16 sps:$4 sm:$0xff]   ;;  %v3876_v34 = vld [vmem:[%s5407_s3 + $0x28] ss:$16 sps:$4 sm:$0xff]  }
   0xa   :  { %601 = vmatpush1.bf16.msra.mxu1 %v3879_v15  ;;  %v3892_v24 = vld [vmem:[%s5407_s3 + $0x84] ss:$16 sps:$4 sm:$0xff]   ;;  %v3897_v27 = vld [vmem:[%s5407_s3 + $0x80] ss:$16 sps:$4 sm:$0xff]   ;;  %v3878_v31 = vld [vmem:[%s5407_s3 + $0x2c] ss:$16 sps:$4 sm:$0xff]  }
   0xb   :  { %148 = vmatpush1.bf16.msra.mxu0 %v3852_v6  ;;  %602 = vmatprep.subr.bf16.mxu1 %v3880_v16  ;;  %v3898_v28 = vld [vmem:[%s5407_s3 + $0xa4] ss:$16 sps:$4 sm:$0xff]   ;;  %v34_v29 = vld [vmem:[%s5404_s0] sm:$0xf]  ;;  %v3884_v35 = vld [vmem:[%s5407_s3 + $0x4c] ss:$16 sps:$4 sm:$0xff]  }
   0xc   :  { %149 = vmatprep.subr.bf16.mxu0 %v3853_v7  ;;  %v3903_v32 = vld [vmem:[%s5407_s3 + $0xa0] ss:$16 sps:$4 sm:$0xff]   ;;  %v3904_v33 = vld [vmem:[%s5407_s3 + $0xc4] ss:$16 sps:$4 sm:$0xff]   ;;  %v3882_v38 = vld [vmem:[%s5407_s3 + $0x48] ss:$16 sps:$4 sm:$0xff]  }
   0xd   :  { %v3909_v36 = vld [vmem:[%s5407_s3 + $0xc0] ss:$16 sps:$4 sm:$0xff]   ;;  %v3910_v37 = vld [vmem:[%s5407_s3 + $0xe4] ss:$16 sps:$4 sm:$0xff]   ;;  %v3890_v39 = vld [vmem:[%s5407_s3 + $0x6c] ss:$16 sps:$4 sm:$0xff]  }
   0xe   :  { %603 = vmatpush1.bf16.msra.mxu1 %v3885_v19  ;;  %v3915_v40 = vld [vmem:[%s5407_s3 + $0xe0] ss:$16 sps:$4 sm:$0xff]   ;;  %v3916_v41 = vld [vmem:[%s5407_s3 + $0x104] ss:$16 sps:$4 sm:$0xff]   ;;  %v3888_v42 = vld [vmem:[%s5407_s3 + $0x68] ss:$16 sps:$4 sm:$0xff]  }
   0xf   :  { %150 = vmatpush1.bf16.msra.mxu0 %v3855_v8  ;;  %604 = vmatprep.subr.bf16.mxu1 %v3886_v20  ;;  %v3896_v43 = vld [vmem:[%s5407_s3 + $0x8c] ss:$16 sps:$4 sm:$0xff]   ;;  %v3921_v44 = vld [vmem:[%s5407_s3 + $0x100] ss:$16 sps:$4 sm:$0xff]   ;;  %v3922_v45 = vld [vmem:[%s5407_s3 + $0x124] ss:$16 sps:$4 sm:$0xff]  }
  0x10   :  { %151 = vmatprep.subr.bf16.mxu0 %v3856_v10  ;;  %v3894_v46 = vld [vmem:[%s5407_s3 + $0x88] ss:$16 sps:$4 sm:$0xff]   ;;  %v3927_v47 = vld [vmem:[%s5407_s3 + $0x120] ss:$16 sps:$4 sm:$0xff]   ;;  %v3902_v48 = vld [vmem:[%s5407_s3 + $0xac] ss:$16 sps:$4 sm:$0xff]  }
  0x11   :  { %v3928_v49 = vld [vmem:[%s5407_s3 + $0x144] ss:$16 sps:$4 sm:$0xff]   ;;  %v3900_v50 = vld [vmem:[%s5407_s3 + $0xa8] ss:$16 sps:$4 sm:$0xff]   ;;  %v3933_v51 = vld [vmem:[%s5407_s3 + $0x140] ss:$16 sps:$4 sm:$0xff]  }
  0x12   :  { %605 = vmatpush1.bf16.msra.mxu1 %v3891_v23  ;;  %v3908_v52 = vld [vmem:[%s5407_s3 + $0xcc] ss:$16 sps:$4 sm:$0xff]   ;;  %v3934_v53 = vld [vmem:[%s5407_s3 + $0x164] ss:$16 sps:$4 sm:$0xff]   ;;  %v3906_v54 = vld [vmem:[%s5407_s3 + $0xc8] ss:$16 sps:$4 sm:$0xff]  }
  0x13   :  { %152 = vmatpush1.bf16.msra.mxu0 %v3858_v13  ;;  %606 = vmatprep.subr.bf16.mxu1 %v3892_v24  ;;  %v3939_v55 = vld [vmem:[%s5407_s3 + $0x160] ss:$16 sps:$4 sm:$0xff]   ;;  %v3914_v56 = vld [vmem:[%s5407_s3 + $0xec] ss:$16 sps:$4 sm:$0xff]   ;;  %v3940_v57 = vld [vmem:[%s5407_s3 + $0x184] ss:$16 sps:$4 sm:$0xff]  }
  0x14   :  { %153 = vmatprep.subr.bf16.mxu0 %v3859_v14  ;;  %v3912_v58 = vld [vmem:[%s5407_s3 + $0xe8] ss:$16 sps:$4 sm:$0xff]   ;;  %v3945_v59 = vld [vmem:[%s5407_s3 + $0x180] ss:$16 sps:$4 sm:$0xff]   ;;  %v3920_v60 = vld [vmem:[%s5407_s3 + $0x10c] ss:$16 sps:$4 sm:$0xff]  }
  0x15   :  { %v3946_v61 = vld [vmem:[%s5407_s3 + $0x1a4] ss:$16 sps:$4 sm:$0xff]   ;;  %v3918_v62 = vld [vmem:[%s5407_s3 + $0x108] ss:$16 sps:$4 sm:$0xff]   ;;  %v3951_v63 = vld [vmem:[%s5407_s3 + $0x1a0] ss:$16 sps:$4 sm:$0xff]  }
  0x16   :  { %607 = vmatpush1.bf16.msra.mxu1 %v3897_v27  ;;  %v3926_v0 = vld [vmem:[%s5407_s3 + $0x12c] ss:$16 sps:$4 sm:$0xff]   ;;  %v3924_v1 = vld [vmem:[%s5407_s3 + $0x128] ss:$16 sps:$4 sm:$0xff]  }
  0x17   :  { %154 = vmatpush1.bf16.msra.mxu0 %v3861_v17  ;;  %608 = vmatprep.subr.bf16.mxu1 %v3898_v28  ;;  %v3932_v2 = vld [vmem:[%s5407_s3 + $0x14c] ss:$16 sps:$4 sm:$0xff]   ;;  %v3930_v3 = vld [vmem:[%s5407_s3 + $0x148] ss:$16 sps:$4 sm:$0xff]  }
  0x18   :  { %155 = vmatprep.subr.bf16.mxu0 %v3862_v18  ;;  %v3938_v4 = vld [vmem:[%s5407_s3 + $0x16c] ss:$16 sps:$4 sm:$0xff]   ;;  %v3936_v5 = vld [vmem:[%s5407_s3 + $0x168] ss:$16 sps:$4 sm:$0xff]  }
  0x19   :  { %v3944_v6 = vld [vmem:[%s5407_s3 + $0x18c] ss:$16 sps:$4 sm:$0xff]   ;;  %v3942_v7 = vld [vmem:[%s5407_s3 + $0x188] ss:$16 sps:$4 sm:$0xff]  }
  0x1a   :  { %609 = vmatpush1.bf16.msra.mxu1 %v3903_v32  ;;  %v3950_v8 = vld [vmem:[%s5407_s3 + $0x1ac] ss:$16 sps:$4 sm:$0xff]   ;;  %v3948_v9 = vld [vmem:[%s5407_s3 + $0x1a8] ss:$16 sps:$4 sm:$0xff]  }
  0x1b   :  { %156 = vmatpush1.bf16.msra.mxu0 %v3864_v21  ;;  %610 = vmatprep.subr.bf16.mxu1 %v3904_v33 }
  0x1c   :  { %157 = vmatprep.subr.bf16.mxu0 %v3865_v22 }
  0x1e   :  { %611 = vmatpush1.bf16.msra.mxu1 %v3909_v36 }
  0x1f   :  { %158 = vmatpush1.bf16.msra.mxu0 %v3867_v25  ;;  %612 = vmatprep.subr.bf16.mxu1 %v3910_v37 }
  0x20   :  { %639 = vmatprep.subr.bf16.mxu0 %v3872_v26 }
  0x22   :  { %176 = vmatmul.mubr.bf16.vlgmr.msra.gmra.mrb[0].mxu0 %v34_v29  ;;  %613 = vmatpush1.bf16.msra.mxu1 %v3915_v40 }
  0x23   :  { %640 = vmatpush1.bf16.msra.mxu0 %v3870_v30  ;;  %614 = vmatprep.subr.bf16.mxu1 %v3916_v41 }
  0x24   :  { %641 = vmatprep.subr.bf16.mxu0 %v3878_v31 }
  0x26   :  { %615 = vmatpush1.bf16.msra.mxu1 %v3921_v44 }
  0x27   :  { %642 = vmatpush1.bf16.msra.mxu0 %v3876_v34  ;;  %616 = vmatprep.subr.bf16.mxu1 %v3922_v45 }
  0x28   :  { %643 = vmatprep.subr.bf16.mxu0 %v3884_v35 }
  0x2a   :  { %617 = vmatpush1.bf16.msra.mxu1 %v3927_v47 }
  0x2b   :  { %644 = vmatpush1.bf16.msra.mxu0 %v3882_v38  ;;  %618 = vmatprep.subr.bf16.mxu1 %v3928_v49 }
  0x2c   :  { %645 = vmatprep.subr.bf16.mxu0 %v3890_v39 }
  0x2e   :  { %619 = vmatpush1.bf16.msra.mxu1 %v3933_v51 }
  0x2f   :  { %646 = vmatpush1.bf16.msra.mxu0 %v3888_v42  ;;  %620 = vmatprep.subr.bf16.mxu1 %v3934_v53 }
  0x30   :  { %647 = vmatprep.subr.bf16.mxu0 %v3896_v43 }
  0x32   :  { %621 = vmatpush1.bf16.msra.mxu1 %v3939_v55 }
  0x33   :  { %648 = vmatpush1.bf16.msra.mxu0 %v3894_v46  ;;  %622 = vmatprep.subr.bf16.mxu1 %v3940_v57 }
  0x34   :  { %649 = vmatprep.subr.bf16.mxu0 %v3902_v48 }
  0x36   :  { %623 = vmatpush1.bf16.msra.mxu1 %v3945_v59 }
  0x37   :  { %650 = vmatpush1.bf16.msra.mxu0 %v3900_v50  ;;  %624 = vmatprep.subr.bf16.mxu1 %v3946_v61 }
  0x38   :  { %651 = vmatprep.subr.bf16.mxu0 %v3908_v52 }
  0x3a   :  { %625 = vmatpush1.bf16.msra.mxu1 %v3951_v63 }
  0x3b   :  { %652 = vmatpush1.bf16.msra.mxu0 %v3906_v54 }
  0x3c   :  { %653 = vmatprep.subr.bf16.mxu0 %v3914_v56 }
  0x3f   :  { %654 = vmatpush1.bf16.msra.mxu0 %v3912_v58 }
  0x40   :  { %655 = vmatprep.subr.bf16.mxu0 %v3920_v60 }
  0x43   :  { %656 = vmatpush1.bf16.msra.mxu0 %v3918_v62 }
  0x44   :  { %657 = vmatprep.subr.bf16.mxu0 %v3926_v0 }
  0x47   :  { %658 = vmatpush1.bf16.msra.mxu0 %v3924_v1 }
  0x48   :  { %659 = vmatprep.subr.bf16.mxu0 %v3932_v2 }
  0x4b   :  { %660 = vmatpush1.bf16.msra.mxu0 %v3930_v3 }
  0x4c   :  { %661 = vmatprep.subr.bf16.mxu0 %v3938_v4 }
  0x4f   :  { %662 = vmatpush1.bf16.msra.mxu0 %v3936_v5 }
  0x50   :  { %663 = vmatprep.subr.bf16.mxu0 %v3944_v6 }
  0x53   :  { %664 = vmatpush1.bf16.msra.mxu0 %v3942_v7 }
  0x54   :  { %665 = vmatprep.subr.bf16.mxu0 %v3950_v8 }
  0x57   :  { %666 = vmatpush1.bf16.msra.mxu0 %v3948_v9 }
  0x58   :  { %14 = vsyncpa [#allocation3], 0  ;;  %v3952_v10 = vld [vmem:[%s5407_s3 + $0x1c4] ss:$16 sps:$4 sm:$0xff]   ;;  %v3956_v11 = vld [vmem:[%s5407_s3 + $0x1cc] ss:$16 sps:$4 sm:$0xff]   ;;  %v53_v26 = vlaneseq }
  0x59   :  { %v3954_v12 = vld [vmem:[%s5407_s3 + $0x1c8] ss:$16 sps:$4 sm:$0xff]   ;;  %v3957_v13 = vld [vmem:[%s5407_s3 + $0x1c0] ss:$16 sps:$4 sm:$0xff]   ;;  %626 = vmatprep.subr.bf16.mxu1 %v3952_v10  ;;  %667 = vmatprep.subr.bf16.mxu0 %v3956_v11  ;;  %v3958_v14 = vld [vmem:[%s5407_s3 + $0x1e4] ss:$16 sps:$4 sm:$0xff]  }
  0x5a   :  { %627 = vmatpush1.bf16.msra.mxu1 %v3957_v13  ;;  %v3960_v15 = vld [vmem:[%s5407_s3 + $0x1e8] ss:$16 sps:$4 sm:$0xff]   ;;  %v3962_v16 = vld [vmem:[%s5407_s3 + $0x1ec] ss:$16 sps:$4 sm:$0xff]   ;;  %v3963_v17 = vld [vmem:[%s5407_s3 + $0x1e0] ss:$16 sps:$4 sm:$0xff]  }
  0x5b   :  { %668 = vmatpush1.bf16.msra.mxu0 %v3954_v12  ;;  %628 = vmatprep.subr.bf16.mxu1 %v3958_v14  ;;  %v696_v18 = vld [vmem:[%s5409_s5] sm:$0xff]  ;;  %v697_v20 = vld [vmem:[%s5409_s5 + $0x8] sm:$0xff]  ;;  %v4361_v27 = vshrl.u32 %v53_v26, 7 }
  0x5c   :  { %669 = vmatprep.subr.bf16.mxu0 %v3962_v16  ;;  %v700_v19 = vld [vmem:[%s5409_s5 + $0x20] sm:$0xff]  ;;  %v701_v23 = vld [vmem:[%s5409_s5 + $0x28] sm:$0xff] }
  0x5d   :  { %v3409_v21 = vcombine.low %v696_v18, %v700_v19  ;;  %v3410_v22 = vcombine.high %v696_v18, %v700_v19  ;;  %v3411_v24 = vcombine.low %v697_v20, %v701_v23  ;;  %v3412_v25 = vcombine.high %v697_v20, %v701_v23  ;;  %v51_v29 = vld [vmem:[%s5406_s2] sm:$0x3]  ;;  %v705_v44 = vld [vmem:[%s5409_s5 + $0x48] sm:$0xff] }
  0x5e   :  { %629 = vmatpush1.bf16.msra.mxu1 %v3963_v17  ;;  %v4364_v28 = vsub.s32 0, %v4361_v27  ;;  %v4370_v30 = vsub.s32 1, %v4361_v27  ;;  %v704_v41 = vld [vmem:[%s5409_s5 + $0x40] sm:$0xff]  ;;  %v709_v45 = vld [vmem:[%s5409_s5 + $0x68] sm:$0xff] }
  0x5f   :  { %670 = vmatpush1.bf16.msra.mxu0 %v3960_v15  ;;  %2274 = vmatprep.subr.bf16.mxu1 %v3410_v22  ;;  %v708_v43 = vld [vmem:[%s5409_s5 + $0x60] sm:$0xff]  ;;  %v3420_v50 = vcombine.high %v705_v44, %v709_v45  ;;  %v713_v53 = vld [vmem:[%s5409_s5 + $0x88] sm:$0xff]  ;;  %v3419_v56 = vcombine.low %v705_v44, %v709_v45 }
  0x60   :  { %2356 = vmatprep.subr.bf16.mxu0 %v3412_v25  ;;  %v56_v31 = vrot.slane %v51_v29, %v4364_v28  ;;  %v60_v32 = vrot.slane %v51_v29, %v4370_v30  ;;  %v3418_v49 = vcombine.high %v704_v41, %v708_v43  ;;  %v712_v51 = vld [vmem:[%s5409_s5 + $0x80] sm:$0xff]  ;;  %v717_v54 = vld [vmem:[%s5409_s5 + $0xa8] sm:$0xff]  ;;  %v3417_v55 = vcombine.low %v704_v41, %v708_v43 }
  0x61   :  { %v716_v52 = vld [vmem:[%s5409_s5 + $0xa0] sm:$0xff]  ;;  %v3428_v58 = vcombine.high %v713_v53, %v717_v54  ;;  %v721_v61 = vld [vmem:[%s5409_s5 + $0xc8] sm:$0xff]  ;;  %v3427_v0 = vcombine.low %v713_v53, %v717_v54 }
  0x62   :  { %v3426_v57 = vcombine.high %v712_v51, %v716_v52  ;;  %v720_v59 = vld [vmem:[%s5409_s5 + $0xc0] sm:$0xff]  ;;  %v725_v62 = vld [vmem:[%s5409_s5 + $0xe8] sm:$0xff]  ;;  %v3425_v63 = vcombine.low %v712_v51, %v716_v52 }
  0x63   :  { %v724_v60 = vld [vmem:[%s5409_s5 + $0xe0] sm:$0xff]  ;;  %v3436_v2 = vcombine.high %v721_v61, %v725_v62  ;;  %v729_v5 = vld [vmem:[%s5409_s5 + $0x108] sm:$0xff]  ;;  %v3435_v8 = vcombine.low %v721_v61, %v725_v62 }
  0x64   :  { %v3434_v1 = vcombine.high %v720_v59, %v724_v60  ;;  %v728_v3 = vld [vmem:[%s5409_s5 + $0x100] sm:$0xff]  ;;  %v733_v6 = vld [vmem:[%s5409_s5 + $0x128] sm:$0xff]  ;;  %v3433_v7 = vcombine.low %v720_v59, %v724_v60 }
  0x65   :  { %v732_v4 = vld [vmem:[%s5409_s5 + $0x120] sm:$0xff]  ;;  %v3444_v10 = vcombine.high %v729_v5, %v733_v6  ;;  %v737_v13 = vld [vmem:[%s5409_s5 + $0x148] sm:$0xff]  ;;  %v3443_v16 = vcombine.low %v729_v5, %v733_v6 }
  0x66   :  { %v3442_v9 = vcombine.high %v728_v3, %v732_v4  ;;  %v736_v11 = vld [vmem:[%s5409_s5 + $0x140] sm:$0xff]  ;;  %v741_v14 = vld [vmem:[%s5409_s5 + $0x168] sm:$0xff]  ;;  %v3441_v15 = vcombine.low %v728_v3, %v732_v4 }
  0x67   :  { %v740_v12 = vld [vmem:[%s5409_s5 + $0x160] sm:$0xff]  ;;  %v3452_v18 = vcombine.high %v737_v13, %v741_v14  ;;  %v749_v22 = vld [vmem:[%s5409_s5 + $0x1a8] sm:$0xff] }
  0x68   :  { %v3450_v17 = vcombine.high %v736_v11, %v740_v12  ;;  %v744_v19 = vld [vmem:[%s5409_s5 + $0x180] sm:$0xff]  ;;  %v3449_v23 = vcombine.low %v736_v11, %v740_v12  ;;  %v765_v41 = vld [vmem:[%s5409_s5 + $0x228] sm:$0xff] }
  0x69   :  { %v748_v20 = vld [vmem:[%s5409_s5 + $0x1a0] sm:$0xff] }
  0x6a   :  { %v3458_v25 = vcombine.high %v744_v19, %v748_v20  ;;  %v752_v29 = vld [vmem:[%s5409_s5 + $0x1c0] sm:$0xff] }
  0x6b   :  { %v776_v54 = vld [vmem:[%s5409_s5 + $0x280] sm:$0xff] }
  0x6c   :  { %v784_v62 = vld [vmem:[%s5409_s5 + $0x2c0] sm:$0xff] }
  0x6d   :  { %v792_v6 = vld [vmem:[%s5409_s5 + $0x300] sm:$0xff] }
  0xf5   :  { %v177_v33 = vpop.f32.mrb[0].mxu0 }
  0xf6   :  { %v178_v34 = vadd.f32 %v177_v33, %v56_v31  ;;  %v179_v35 = vpop.f32.mrb[1].mxu0  ;;  %v756_v31 = vld [vmem:[%s5409_s5 + $0x1e0] sm:$0xff]  ;;  %v757_v33 = vld [vmem:[%s5409_s5 + $0x1e8] sm:$0xff] }
  0xf7   :  { %v180_v36 = vadd.f32 %v179_v35, %v60_v32  ;;  %v181_v37 = vpop.f32.mrb[2].mxu0  ;;  %v753_v32 = vld [vmem:[%s5409_s5 + $0x1c8] sm:$0xff] }
  0xf8   :  { %vm184_vm0 = vcmp.gt.f32.partialorder %v178_v34, 0.0  ;;  %v186_v38 = vmul.f32 0.2, %v178_v34  ;;  %v182_v39 = vpop.f32.mrb[3].mxu0  ;;  %v3468_v37 = vcombine.high %v753_v32, %v757_v33  ;;  %v3467_v43 = vcombine.low %v753_v32, %v757_v33 }
  0xf9   :  { %v187_v40 = vmul.f32 0.2, %v180_v36  ;;  %vm185_vm1 = vcmp.gt.f32.partialorder %v180_v36, 0.0  ;;  %v764_v39 = vld [vmem:[%s5409_s5 + $0x220] sm:$0xff] }
  0xfa   :  { %v188_v42 = vsel %vm184_vm0, %v178_v34, %v186_v38  ;;  %v3457_v34 = vcombine.low %v744_v19, %v748_v20  ;;  %v760_v38 = vld [vmem:[%s5409_s5 + $0x200] sm:$0xff] }
  0xfb   :  { %v189_v46 = vsel %vm185_vm1, %v180_v36, %v187_v40  ;;  %v190_v48 = vpack.c.bf16 %v188_v42, %v188_v42  ;;  %v3466_v36 = vcombine.high %v752_v29, %v756_v31  ;;  %v761_v40 = vld [vmem:[%s5409_s5 + $0x208] sm:$0xff]  ;;  %v3465_v42 = vcombine.low %v752_v29, %v756_v31 }
  0xfc   :  { %v191_v47 = vpack.c.bf16 %v189_v46, %v189_v46  ;;  %v3474_v44 = vcombine.high %v760_v38, %v764_v39  ;;  %v3476_v45 = vcombine.high %v761_v40, %v765_v41  ;;  %v768_v46 = vld [vmem:[%s5409_s5 + $0x240] sm:$0xff]  ;;  %v3475_v51 = vcombine.low %v761_v40, %v765_v41  ;;  %v813_v31 = vld [vmem:[%s5409_s5 + $0x3a8] sm:$0xff] }
  0xfe   :  { %630 = vmatprep.mubr.bf16.mxu1 %v191_v47  ;;  %671 = vmatprep.mubr.bf16.mxu0 %v191_v47  ;;  %v772_v47 = vld [vmem:[%s5409_s5 + $0x260] sm:$0xff] }
  0xff   :  { %631 = vmatmul.mubr.bf16.vlgmr.msra.gmra.mrb[0].mxu1 %v190_v48  ;;  %672 = vmatmul.mubr.bf16.vlgmr.msra.gmra.mrb[4].mxu0 %v190_v48  ;;  %v769_v48 = vld [vmem:[%s5409_s5 + $0x248] sm:$0xff]  ;;  %v3482_v52 = vcombine.high %v768_v46, %v772_v47 }
 0x100   :  { %2275 = vmatpush1.bf16.msra.mxu1 %v3409_v21  ;;  %2357 = vmatpush1.bf16.msra.mxu0 %v3411_v24  ;;  %v745_v21 = vld [vmem:[%s5409_s5 + $0x188] sm:$0xff]  ;;  %v3451_v24 = vcombine.low %v737_v13, %v741_v14  ;;  %v800_v14 = vld [vmem:[%s5409_s5 + $0x340] sm:$0xff] }
 0x101   :  { %2276 = vmatprep.subr.bf16.mxu1 %v3418_v49  ;;  %2358 = vmatprep.subr.bf16.mxu0 %v3420_v50  ;;  %v3460_v26 = vcombine.high %v745_v21, %v749_v22  ;;  %v3459_v35 = vcombine.low %v745_v21, %v749_v22  ;;  %v773_v49 = vld [vmem:[%s5409_s5 + $0x268] sm:$0xff]  ;;  %v3473_v50 = vcombine.low %v760_v38, %v764_v39 }
 0x102   :  { %v3484_v53 = vcombine.high %v769_v48, %v773_v49  ;;  %v3483_v59 = vcombine.low %v769_v48, %v773_v49  ;;  %v821_v39 = vld [vmem:[%s5409_s5 + $0x3e8] sm:$0xff] }
 0x103   :  { %v829_v48 = vld [vmem:[%s5409_s5 + $0x428] sm:$0xff] }
 0x104   :  { %2277 = vmatpush1.bf16.msra.mxu1 %v3417_v55  ;;  %2359 = vmatpush1.bf16.msra.mxu0 %v3419_v56  ;;  %v780_v55 = vld [vmem:[%s5409_s5 + $0x2a0] sm:$0xff]  ;;  %v777_v56 = vld [vmem:[%s5409_s5 + $0x288] sm:$0xff] }
 0x105   :  { %2278 = vmatprep.subr.bf16.mxu1 %v3426_v57  ;;  %2360 = vmatprep.subr.bf16.mxu0 %v3428_v58  ;;  %v781_v57 = vld [vmem:[%s5409_s5 + $0x2a8] sm:$0xff]  ;;  %v3481_v58 = vcombine.low %v768_v46, %v772_v47  ;;  %v3490_v60 = vcombine.high %v776_v54, %v780_v55 }
 0x106   :  { %v3492_v61 = vcombine.high %v777_v56, %v781_v57  ;;  %v3491_v3 = vcombine.low %v777_v56, %v781_v57 }
 0x108   :  { %2279 = vmatpush1.bf16.msra.mxu1 %v3425_v63  ;;  %2361 = vmatpush1.bf16.msra.mxu0 %v3427_v0  ;;  %v788_v63 = vld [vmem:[%s5409_s5 + $0x2e0] sm:$0xff]  ;;  %v785_v0 = vld [vmem:[%s5409_s5 + $0x2c8] sm:$0xff] }
 0x109   :  { %2280 = vmatprep.subr.bf16.mxu1 %v3434_v1  ;;  %2362 = vmatprep.subr.bf16.mxu0 %v3436_v2  ;;  %v789_v1 = vld [vmem:[%s5409_s5 + $0x2e8] sm:$0xff]  ;;  %v3489_v2 = vcombine.low %v776_v54, %v780_v55  ;;  %v3498_v4 = vcombine.high %v784_v62, %v788_v63 }
 0x10a   :  { %v3500_v5 = vcombine.high %v785_v0, %v789_v1  ;;  %v3499_v11 = vcombine.low %v785_v0, %v789_v1 }
 0x10c   :  { %2281 = vmatpush1.bf16.msra.mxu1 %v3433_v7  ;;  %2363 = vmatpush1.bf16.msra.mxu0 %v3435_v8  ;;  %v796_v7 = vld [vmem:[%s5409_s5 + $0x320] sm:$0xff]  ;;  %v793_v8 = vld [vmem:[%s5409_s5 + $0x308] sm:$0xff] }
 0x10d   :  { %2282 = vmatprep.subr.bf16.mxu1 %v3442_v9  ;;  %2364 = vmatprep.subr.bf16.mxu0 %v3444_v10  ;;  %v797_v9 = vld [vmem:[%s5409_s5 + $0x328] sm:$0xff]  ;;  %v3497_v10 = vcombine.low %v784_v62, %v788_v63  ;;  %v3506_v12 = vcombine.high %v792_v6, %v796_v7 }
 0x10e   :  { %v3508_v13 = vcombine.high %v793_v8, %v797_v9  ;;  %v3507_v19 = vcombine.low %v793_v8, %v797_v9  ;;  %v836_v9 = vld [vmem:[%s5409_s5 + $0x460] sm:$0xff] }
 0x110   :  { %2283 = vmatpush1.bf16.msra.mxu1 %v3441_v15  ;;  %2365 = vmatpush1.bf16.msra.mxu0 %v3443_v16  ;;  %v804_v15 = vld [vmem:[%s5409_s5 + $0x360] sm:$0xff]  ;;  %v801_v16 = vld [vmem:[%s5409_s5 + $0x348] sm:$0xff] }
 0x111   :  { %2284 = vmatprep.subr.bf16.mxu1 %v3450_v17  ;;  %2366 = vmatprep.subr.bf16.mxu0 %v3452_v18  ;;  %v805_v17 = vld [vmem:[%s5409_s5 + $0x368] sm:$0xff]  ;;  %v3505_v18 = vcombine.low %v792_v6, %v796_v7  ;;  %v3514_v20 = vcombine.high %v800_v14, %v804_v15  ;;  %v3513_v22 = vcombine.low %v800_v14, %v804_v15  ;;  %v832_v7 = vld [vmem:[%s5409_s5 + $0x440] sm:$0xff] }
 0x112   :  { %v3516_v21 = vcombine.high %v801_v16, %v805_v17  ;;  %v840_v15 = vld [vmem:[%s5409_s5 + $0x480] sm:$0xff] }
 0x114   :  { %2285 = vmatpush1.bf16.msra.mxu1 %v3449_v23  ;;  %2367 = vmatpush1.bf16.msra.mxu0 %v3451_v24  ;;  %v3515_v23 = vcombine.low %v801_v16, %v805_v17  ;;  %v808_v24 = vld [vmem:[%s5409_s5 + $0x380] sm:$0xff]  ;;  %v3546_v16 = vcombine.high %v832_v7, %v836_v9 }
 0x115   :  { %2286 = vmatprep.subr.bf16.mxu1 %v3458_v25  ;;  %2368 = vmatprep.subr.bf16.mxu0 %v3460_v26  ;;  %v812_v25 = vld [vmem:[%s5409_s5 + $0x3a0] sm:$0xff]  ;;  %v809_v26 = vld [vmem:[%s5409_s5 + $0x388] sm:$0xff] }
 0x116   :  { %v3522_v29 = vcombine.high %v808_v24, %v812_v25  ;;  %v3521_v32 = vcombine.low %v808_v24, %v812_v25  ;;  %v3523_v33 = vcombine.low %v809_v26, %v813_v31 }
 0x118   :  { %2287 = vmatpush1.bf16.msra.mxu1 %v3457_v34  ;;  %2369 = vmatpush1.bf16.msra.mxu0 %v3459_v35  ;;  %v3524_v34 = vcombine.high %v809_v26, %v813_v31  ;;  %v816_v35 = vld [vmem:[%s5409_s5 + $0x3c0] sm:$0xff]  ;;  %v849_v31 = vld [vmem:[%s5409_s5 + $0x4c8] sm:$0xff] }
 0x119   :  { %2288 = vmatprep.subr.bf16.mxu1 %v3466_v36  ;;  %2370 = vmatprep.subr.bf16.mxu0 %v3468_v37  ;;  %v820_v36 = vld [vmem:[%s5409_s5 + $0x3e0] sm:$0xff]  ;;  %v817_v37 = vld [vmem:[%s5409_s5 + $0x3c8] sm:$0xff] }
 0x11a   :  { %v3530_v38 = vcombine.high %v816_v35, %v820_v36  ;;  %v3529_v40 = vcombine.low %v816_v35, %v820_v36  ;;  %v3531_v41 = vcombine.low %v817_v37, %v821_v39  ;;  %v848_v26 = vld [vmem:[%s5409_s5 + $0x4c0] sm:$0xff] }
 0x11c   :  { %2289 = vmatpush1.bf16.msra.mxu1 %v3465_v42  ;;  %2371 = vmatpush1.bf16.msra.mxu0 %v3467_v43  ;;  %v3532_v42 = vcombine.high %v817_v37, %v821_v39  ;;  %v824_v43 = vld [vmem:[%s5409_s5 + $0x400] sm:$0xff]  ;;  %v857_v39 = vld [vmem:[%s5409_s5 + $0x508] sm:$0xff] }
 0x11d   :  { %2290 = vmatprep.subr.bf16.mxu1 %v3474_v44  ;;  %2372 = vmatprep.subr.bf16.mxu0 %v3476_v45  ;;  %v828_v44 = vld [vmem:[%s5409_s5 + $0x420] sm:$0xff]  ;;  %v825_v45 = vld [vmem:[%s5409_s5 + $0x408] sm:$0xff] }
 0x11e   :  { %v3537_v46 = vcombine.low %v824_v43, %v828_v44  ;;  %v3538_v47 = vcombine.high %v824_v43, %v828_v44  ;;  %v3539_v49 = vcombine.low %v825_v45, %v829_v48  ;;  %v856_v37 = vld [vmem:[%s5409_s5 + $0x500] sm:$0xff] }
 0x120   :  { %2291 = vmatpush1.bf16.msra.mxu1 %v3473_v50  ;;  %2373 = vmatpush1.bf16.msra.mxu0 %v3475_v51  ;;  %v3540_v50 = vcombine.high %v825_v45, %v829_v48  ;;  %v4569_v51 = vld [vmem:[%s5408_s4] sm:$0xf]  ;;  %v869_v48 = vld [vmem:[%s5409_s5 + $0x568] sm:$0xff] }
 0x121   :  { %2292 = vmatprep.subr.bf16.mxu1 %v3482_v52  ;;  %2374 = vmatprep.subr.bf16.mxu0 %v3484_v53  ;;  %v272_v52 = vsub.s32 3, %v4361_v27  ;;  %v261_v53 = vrot.slane %v4569_v51, %v4364_v28  ;;  %v265_v54 = vrot.slane %v4569_v51, %v4370_v30  ;;  %v864_v45 = vld [vmem:[%s5409_s5 + $0x540] sm:$0xff] }
 0x123   :  { %v273_v55 = vrot.slane %v4569_v51, %v272_v52 }
 0x124   :  { %2293 = vmatpush1.bf16.msra.mxu1 %v3481_v58  ;;  %2375 = vmatpush1.bf16.msra.mxu0 %v3483_v59 }
 0x125   :  { %2294 = vmatprep.subr.bf16.mxu1 %v3490_v60  ;;  %2376 = vmatprep.subr.bf16.mxu0 %v3492_v61 }
 0x128   :  { %2295 = vmatpush1.bf16.msra.mxu1 %v3489_v2  ;;  %2377 = vmatpush1.bf16.msra.mxu0 %v3491_v3 }
 0x129   :  { %2296 = vmatprep.subr.bf16.mxu1 %v3498_v4  ;;  %2378 = vmatprep.subr.bf16.mxu0 %v3500_v5 }
 0x12c   :  { %2297 = vmatpush1.bf16.msra.mxu1 %v3497_v10  ;;  %2379 = vmatpush1.bf16.msra.mxu0 %v3499_v11  ;;  %v833_v10 = vld [vmem:[%s5409_s5 + $0x448] sm:$0xff] }
 0x12d   :  { %2298 = vmatprep.subr.bf16.mxu1 %v3506_v12  ;;  %2380 = vmatprep.subr.bf16.mxu0 %v3508_v13  ;;  %v837_v11 = vld [vmem:[%s5409_s5 + $0x468] sm:$0xff] }
 0x12e   :  { %v3548_v17 = vcombine.high %v833_v10, %v837_v11 }
 0x130   :  { %2299 = vmatpush1.bf16.msra.mxu1 %v3505_v18  ;;  %2381 = vmatpush1.bf16.msra.mxu0 %v3507_v19  ;;  %v844_v18 = vld [vmem:[%s5409_s5 + $0x4a0] sm:$0xff]  ;;  %v841_v19 = vld [vmem:[%s5409_s5 + $0x488] sm:$0xff] }
 0x131   :  { %2300 = vmatprep.subr.bf16.mxu1 %v3514_v20  ;;  %2382 = vmatprep.subr.bf16.mxu0 %v3516_v21  ;;  %v845_v20 = vld [vmem:[%s5409_s5 + $0x4a8] sm:$0xff]  ;;  %v3554_v24 = vcombine.high %v840_v15, %v844_v18 }
 0x132   :  { %v3556_v25 = vcombine.high %v841_v19, %v845_v20 }
 0x134   :  { %2301 = vmatpush1.bf16.msra.mxu1 %v3513_v22  ;;  %2383 = vmatpush1.bf16.msra.mxu0 %v3515_v23  ;;  %v3545_v22 = vcombine.low %v832_v7, %v836_v9  ;;  %v3547_v23 = vcombine.low %v833_v10, %v837_v11  ;;  %v892_v9 = vld [vmem:[%s5409_s5 + $0x620] sm:$0xff]  ;;  %v889_v10 = vld [vmem:[%s5409_s5 + $0x608] sm:$0xff] }
 0x135   :  { %2302 = vmatprep.subr.bf16.mxu1 %v3522_v29  ;;  %2384 = vmatprep.subr.bf16.mxu0 %v3524_v34  ;;  %v852_v29 = vld [vmem:[%s5409_s5 + $0x4e0] sm:$0xff]  ;;  %v3555_v34 = vcombine.low %v841_v19, %v845_v20  ;;  %v893_v11 = vld [vmem:[%s5409_s5 + $0x628] sm:$0xff] }
 0x136   :  { %v3562_v35 = vcombine.high %v848_v26, %v852_v29  ;;  %v900_v19 = vld [vmem:[%s5409_s5 + $0x660] sm:$0xff]  ;;  %v897_v20 = vld [vmem:[%s5409_s5 + $0x648] sm:$0xff] }
 0x138   :  { %2303 = vmatpush1.bf16.msra.mxu1 %v3521_v32  ;;  %2385 = vmatpush1.bf16.msra.mxu0 %v3523_v33  ;;  %v853_v32 = vld [vmem:[%s5409_s5 + $0x4e8] sm:$0xff]  ;;  %v3553_v33 = vcombine.low %v840_v15, %v844_v18  ;;  %v896_v18 = vld [vmem:[%s5409_s5 + $0x640] sm:$0xff] }
 0x139   :  { %2304 = vmatprep.subr.bf16.mxu1 %v3530_v38  ;;  %2386 = vmatprep.subr.bf16.mxu0 %v3532_v42  ;;  %v3564_v36 = vcombine.high %v849_v31, %v853_v32  ;;  %v860_v38 = vld [vmem:[%s5409_s5 + $0x520] sm:$0xff]  ;;  %v3563_v42 = vcombine.low %v849_v31, %v853_v32  ;;  %v905_v32 = vld [vmem:[%s5409_s5 + $0x688] sm:$0xff] }
 0x13a   :  { %v3570_v43 = vcombine.high %v856_v37, %v860_v38  ;;  %v908_v31 = vld [vmem:[%s5409_s5 + $0x6a0] sm:$0xff] }
 0x13c   :  { %2305 = vmatpush1.bf16.msra.mxu1 %v3529_v40  ;;  %2387 = vmatpush1.bf16.msra.mxu0 %v3531_v41  ;;  %v861_v40 = vld [vmem:[%s5409_s5 + $0x528] sm:$0xff]  ;;  %v3561_v41 = vcombine.low %v848_v26, %v852_v29  ;;  %v904_v29 = vld [vmem:[%s5409_s5 + $0x680] sm:$0xff] }
 0x13d   :  { %2315 = vmatprep.subr.bf16.mxu1 %v3538_v47  ;;  %2397 = vmatprep.subr.bf16.mxu0 %v3540_v50  ;;  %v3572_v44 = vcombine.high %v857_v39, %v861_v40  ;;  %v865_v47 = vld [vmem:[%s5409_s5 + $0x548] sm:$0xff]  ;;  %v3571_v50 = vcombine.low %v857_v39, %v861_v40  ;;  %v916_v39 = vld [vmem:[%s5409_s5 + $0x6e0] sm:$0xff] }
 0x13e   :  { %v913_v40 = vld [vmem:[%s5409_s5 + $0x6c8] sm:$0xff] }
 0x1d2   :  { %v632_v56 = vpop.f32.mrb[0].mxu1  ;;  %v4579_v57 = vpop.f32.mrb[4].mxu0 }
 0x1d3   :  { %v633_v58 = vadd.f32 %v632_v56, %v261_v53  ;;  %v634_v59 = vpop.f32.mrb[1].mxu1  ;;  %v675_v60 = vpop.f32.mrb[5].mxu0  ;;  %v876_v56 = vld [vmem:[%s5409_s5 + $0x5a0] sm:$0xff] }
 0x1d4   :  { %v635_v61 = vadd.f32 %v634_v59, %v265_v54  ;;  %v676_v62 = vadd.f32 %v675_v60, %v273_v55  ;;  %v636_v63 = vpop.f32.mrb[2].mxu1  ;;  %v677_v0 = vpop.f32.mrb[6].mxu0  ;;  %v3580_v54 = vcombine.high %v865_v47, %v869_v48  ;;  %v872_v55 = vld [vmem:[%s5409_s5 + $0x580] sm:$0xff]  ;;  %v877_v59 = vld [vmem:[%s5409_s5 + $0x5a8] sm:$0xff] }
 0x1d5   :  { %vm680_vm2 = vcmp.gt.f32.partialorder %v633_v58, 0.0  ;;  %v684_v1 = vmul.f32 0.2, %v633_v58  ;;  %v637_v5 = vpop.f32.mrb[3].mxu1  ;;  %v678_v6 = vpop.f32.mrb[7].mxu0  ;;  %v880_v0 = vld [vmem:[%s5409_s5 + $0x5c0] sm:$0xff] }
 0x1d6   :  { %vm681_vm3 = vcmp.gt.f32.partialorder %v635_v61, 0.0  ;;  %v685_v2 = vmul.f32 0.2, %v635_v61  ;;  %vm683_vm4 = vcmp.gt.f32.partialorder %v676_v62, 0.0  ;;  %v687_v3 = vmul.f32 0.2, %v676_v62 }
 0x1d7   :  { %v688_v4 = vsel %vm680_vm2, %v633_v58, %v684_v1  ;;  %v873_v58 = vld [vmem:[%s5409_s5 + $0x588] sm:$0xff]  ;;  %v884_v1 = vld [vmem:[%s5409_s5 + $0x5e0] sm:$0xff] }
 0x1d8   :  { %v689_v8 = vsel %vm681_vm3, %v635_v61, %v685_v2  ;;  %v691_v13 = vsel %vm683_vm4, %v676_v62, %v687_v3  ;;  %v4595_v14 = vpack.c.bf16 %v688_v4, %v688_v4  ;;  %v3579_v61 = vcombine.low %v865_v47, %v869_v48  ;;  %v881_v2 = vld [vmem:[%s5409_s5 + $0x5c8] sm:$0xff]  ;;  %v924_v47 = vld [vmem:[%s5409_s5 + $0x720] sm:$0xff] }
 0x1d9   :  { %v4593_v12 = vpack.c.bf16 %v689_v8, %v689_v8  ;;  %v4611_v21 = vpack.c.bf16 %v691_v13, %v691_v13  ;;  %v3586_v62 = vcombine.high %v872_v55, %v876_v56  ;;  %v3588_v63 = vcombine.high %v873_v58, %v877_v59  ;;  %v885_v3 = vld [vmem:[%s5409_s5 + $0x5e8] sm:$0xff]  ;;  %v888_v8 = vld [vmem:[%s5409_s5 + $0x600] sm:$0xff] }
 0x1da   :  { %v3585_v4 = vcombine.low %v872_v55, %v876_v56  ;;  %v3587_v5 = vcombine.low %v873_v58, %v877_v59  ;;  %v3594_v6 = vcombine.high %v880_v0, %v884_v1  ;;  %v3596_v7 = vcombine.high %v881_v2, %v885_v3  ;;  %v921_v48 = vld [vmem:[%s5409_s5 + $0x708] sm:$0xff]  ;;  %v928_v56 = vld [vmem:[%s5409_s5 + $0x740] sm:$0xff] }
 0x1db   :  { %2306 = vmatprep.mubr.bf16.mxu1 %v4593_v12  ;;  %2388 = vmatprep.mubr.bf16.mxu0 %v4593_v12  ;;  %v3593_v13 = vcombine.low %v880_v0, %v884_v1  ;;  %v3595_v15 = vcombine.low %v881_v2, %v885_v3  ;;  %v268_v58 = vsub.s32 2, %v4361_v27  ;;  %v932_v59 = vld [vmem:[%s5409_s5 + $0x760] sm:$0xff] }
 0x1dc   :  { %2307 = vmatmul.mubr.bf16.vlgmr.msra.gmra.mrb[4].mxu1 %v4595_v14  ;;  %2389 = vmatmul.mubr.bf16.vlgmr.msra.gmra.mrb[8].mxu0 %v4595_v14  ;;  %v3642_v0 = vcombine.high %v928_v56, %v932_v59  ;;  %v936_v2 = vld [vmem:[%s5409_s5 + $0x780] sm:$0xff] }
 0x1dd   :  { %2316 = vmatpush1.bf16.msra.mxu1 %v3537_v46  ;;  %2398 = vmatpush1.bf16.msra.mxu0 %v3539_v49  ;;  %v868_v46 = vld [vmem:[%s5409_s5 + $0x560] sm:$0xff]  ;;  %v3569_v49 = vcombine.low %v856_v37, %v860_v38  ;;  %v269_v3 = vrot.slane %v4569_v51, %v268_v58 }
 0x1de   :  { %2347 = vmatprep.mubr.bf16.mxu1 %v4611_v21  ;;  %2429 = vmatprep.mubr.bf16.mxu0 %v4611_v21  ;;  %v3578_v53 = vcombine.high %v864_v45, %v868_v46  ;;  %v3577_v60 = vcombine.low %v864_v45, %v868_v46  ;;  %v912_v38 = vld [vmem:[%s5409_s5 + $0x6c0] sm:$0xff] }
 0x1df   :  { %2317 = vmatprep.subr.bf16.mxu1 %v3546_v16  ;;  %2399 = vmatprep.subr.bf16.mxu0 %v3548_v17  ;;  %v3602_v16 = vcombine.high %v888_v8, %v892_v9  ;;  %v3604_v17 = vcombine.high %v889_v10, %v893_v11  ;;  %v920_v46 = vld [vmem:[%s5409_s5 + $0x700] sm:$0xff] }
 0x1e1   :  { %2318 = vmatpush1.bf16.msra.mxu1 %v3545_v22  ;;  %2400 = vmatpush1.bf16.msra.mxu0 %v3547_v23  ;;  %v901_v22 = vld [vmem:[%s5409_s5 + $0x668] sm:$0xff]  ;;  %v3601_v23 = vcombine.low %v888_v8, %v892_v9 }
 0x1e2   :  { %2319 = vmatprep.subr.bf16.mxu1 %v3554_v24  ;;  %2401 = vmatprep.subr.bf16.mxu0 %v3556_v25  ;;  %v3603_v24 = vcombine.low %v889_v10, %v893_v11  ;;  %v3610_v25 = vcombine.high %v896_v18, %v900_v19  ;;  %v3612_v26 = vcombine.high %v897_v20, %v901_v22  ;;  %v944_v10 = vld [vmem:[%s5409_s5 + $0x7c0] sm:$0xff] }
 0x1e3   :  { %v674_v11 = vadd.f32 %v4579_v57, %v269_v3 }
 0x1e5   :  { %2320 = vmatpush1.bf16.msra.mxu1 %v3553_v33  ;;  %2402 = vmatpush1.bf16.msra.mxu0 %v3555_v34  ;;  %v909_v33 = vld [vmem:[%s5409_s5 + $0x6a8] sm:$0xff]  ;;  %v3609_v34 = vcombine.low %v896_v18, %v900_v19  ;;  %vm682_vm5 = vcmp.gt.f32.partialorder %v674_v11, 0.0 }
 0x1e6   :  { %2321 = vmatprep.subr.bf16.mxu1 %v3562_v35  ;;  %2403 = vmatprep.subr.bf16.mxu0 %v3564_v36  ;;  %v3611_v35 = vcombine.low %v897_v20, %v901_v22  ;;  %v3618_v36 = vcombine.high %v904_v29, %v908_v31  ;;  %v3620_v37 = vcombine.high %v905_v32, %v909_v33  ;;  %v698_v20 = vld [vmem:[%s5409_s5 + $0x10] sm:$0xff]  ;;  %v686_v22 = vmul.f32 0.2, %v674_v11 }
 0x1e9   :  { %2322 = vmatpush1.bf16.msra.mxu1 %v3561_v41  ;;  %2404 = vmatpush1.bf16.msra.mxu0 %v3563_v42  ;;  %v917_v41 = vld [vmem:[%s5409_s5 + $0x6e8] sm:$0xff]  ;;  %v3617_v42 = vcombine.low %v904_v29, %v908_v31 }
 0x1ea   :  { %2323 = vmatprep.subr.bf16.mxu1 %v3570_v43  ;;  %2405 = vmatprep.subr.bf16.mxu0 %v3572_v44  ;;  %v3619_v43 = vcombine.low %v905_v32, %v909_v33  ;;  %v3626_v44 = vcombine.high %v912_v38, %v916_v39  ;;  %v3628_v45 = vcombine.high %v913_v40, %v917_v41 }
 0x1eb   :  { %v690_v33 = vsel %vm682_vm5, %v674_v11, %v686_v22 }
 0x1ed   :  { %2324 = vmatpush1.bf16.msra.mxu1 %v3569_v49  ;;  %2406 = vmatpush1.bf16.msra.mxu0 %v3571_v50  ;;  %v925_v49 = vld [vmem:[%s5409_s5 + $0x728] sm:$0xff]  ;;  %v3625_v50 = vcombine.low %v912_v38, %v916_v39  ;;  %v4802_v39 = vpack.c.bf16 %v690_v33, %v690_v33 }
 0x1ee   :  { %2325 = vmatprep.subr.bf16.mxu1 %v3578_v53  ;;  %2407 = vmatprep.subr.bf16.mxu0 %v3580_v54  ;;  %v3627_v53 = vcombine.low %v913_v40, %v917_v41  ;;  %v3634_v54 = vcombine.high %v920_v46, %v924_v47  ;;  %v3636_v55 = vcombine.high %v921_v48, %v925_v49 }
 0x1f1   :  { %2326 = vmatpush1.bf16.msra.mxu1 %v3577_v60  ;;  %2408 = vmatpush1.bf16.msra.mxu0 %v3579_v61  ;;  %v929_v60 = vld [vmem:[%s5409_s5 + $0x748] sm:$0xff] }
 0x1f2   :  { %2327 = vmatprep.subr.bf16.mxu1 %v3586_v62  ;;  %2409 = vmatprep.subr.bf16.mxu0 %v3588_v63  ;;  %v933_v61 = vld [vmem:[%s5409_s5 + $0x768] sm:$0xff]  ;;  %v3633_v62 = vcombine.low %v920_v46, %v924_v47  ;;  %v3635_v63 = vcombine.low %v921_v48, %v925_v49  ;;  %v719_v46 = vld [vmem:[%s5409_s5 + $0xb8] sm:$0xff] }
 0x1f3   :  { %v3644_v1 = vcombine.high %v929_v60, %v933_v61  ;;  %v3643_v8 = vcombine.low %v929_v60, %v933_v61 }
 0x1f5   :  { %2328 = vmatpush1.bf16.msra.mxu1 %v3585_v4  ;;  %2410 = vmatpush1.bf16.msra.mxu0 %v3587_v5  ;;  %v940_v4 = vld [vmem:[%s5409_s5 + $0x7a0] sm:$0xff]  ;;  %v937_v5 = vld [vmem:[%s5409_s5 + $0x788] sm:$0xff] }
 0x1f6   :  { %2329 = vmatprep.subr.bf16.mxu1 %v3594_v6  ;;  %2411 = vmatprep.subr.bf16.mxu0 %v3596_v7  ;;  %v941_v6 = vld [vmem:[%s5409_s5 + $0x7a8] sm:$0xff]  ;;  %v3641_v7 = vcombine.low %v928_v56, %v932_v59  ;;  %v3650_v9 = vcombine.high %v936_v2, %v940_v4 }
 0x1f7   :  { %v3652_v51 = vcombine.high %v937_v5, %v941_v6  ;;  %v3651_v18 = vcombine.low %v937_v5, %v941_v6  ;;  %v738_v6 = vld [vmem:[%s5409_s5 + $0x150] sm:$0xff] }
 0x1f9   :  { %2330 = vmatpush1.bf16.msra.mxu1 %v3593_v13  ;;  %2412 = vmatpush1.bf16.msra.mxu0 %v3595_v15  ;;  %v948_v13 = vld [vmem:[%s5409_s5 + $0x7e0] sm:$0xff]  ;;  %v945_v15 = vld [vmem:[%s5409_s5 + $0x7c8] sm:$0xff] }
 0x1fa   :  { %2331 = vmatprep.subr.bf16.mxu1 %v3602_v16  ;;  %2413 = vmatprep.subr.bf16.mxu0 %v3604_v17  ;;  %v949_v16 = vld [vmem:[%s5409_s5 + $0x7e8] sm:$0xff]  ;;  %v3649_v17 = vcombine.low %v936_v2, %v940_v4  ;;  %v3658_v19 = vcombine.high %v944_v10, %v948_v13 }
 0x1fb   :  { %v3660_v57 = vcombine.high %v945_v15, %v949_v16  ;;  %v3659_v29 = vcombine.low %v945_v15, %v949_v16  ;;  %v746_v15 = vld [vmem:[%s5409_s5 + $0x190] sm:$0xff] }
 0x1fc   :  { %v750_v16 = vld [vmem:[%s5409_s5 + $0x1b0] sm:$0xff] }
 0x1fd   :  { %2332 = vmatpush1.bf16.msra.mxu1 %v3601_v23  ;;  %2414 = vmatpush1.bf16.msra.mxu0 %v3603_v24  ;;  %v702_v23 = vld [vmem:[%s5409_s5 + $0x30] sm:$0xff]  ;;  %v699_v24 = vld [vmem:[%s5409_s5 + $0x18] sm:$0xff] }
 0x1fe   :  { %2333 = vmatprep.subr.bf16.mxu1 %v3610_v25  ;;  %2415 = vmatprep.subr.bf16.mxu0 %v3612_v26  ;;  %v703_v25 = vld [vmem:[%s5409_s5 + $0x38] sm:$0xff]  ;;  %v3657_v26 = vcombine.low %v944_v10, %v948_v13  ;;  %v3414_v31 = vcombine.high %v698_v20, %v702_v23  ;;  %v3413_v38 = vcombine.low %v698_v20, %v702_v23  ;;  %v754_v23 = vld [vmem:[%s5409_s5 + $0x1d0] sm:$0xff] }
 0x1ff   :  { %v3416_v32 = vcombine.high %v699_v24, %v703_v25  ;;  %v3415_v40 = vcombine.low %v699_v24, %v703_v25  ;;  %v3462_v20 = vcombine.high %v746_v15, %v750_v16  ;;  %v758_v24 = vld [vmem:[%s5409_s5 + $0x1f0] sm:$0xff]  ;;  %v755_v25 = vld [vmem:[%s5409_s5 + $0x1d8] sm:$0xff] }
 0x201   :  { %2334 = vmatpush1.bf16.msra.mxu1 %v3609_v34  ;;  %2416 = vmatpush1.bf16.msra.mxu0 %v3611_v35  ;;  %v706_v34 = vld [vmem:[%s5409_s5 + $0x50] sm:$0xff] }
 0x202   :  { %2335 = vmatprep.subr.bf16.mxu1 %v3618_v36  ;;  %2417 = vmatprep.subr.bf16.mxu0 %v3620_v37  ;;  %v710_v35 = vld [vmem:[%s5409_s5 + $0x70] sm:$0xff]  ;;  %v707_v36 = vld [vmem:[%s5409_s5 + $0x58] sm:$0xff] }
 0x203   :  { %v711_v37 = vld [vmem:[%s5409_s5 + $0x78] sm:$0xff]  ;;  %v3422_v41 = vcombine.high %v706_v34, %v710_v35  ;;  %v3421_v47 = vcombine.low %v706_v34, %v710_v35  ;;  %v762_v34 = vld [vmem:[%s5409_s5 + $0x210] sm:$0xff] }
 0x204   :  { %v3423_v48 = vcombine.low %v707_v36, %v711_v37  ;;  %v766_v35 = vld [vmem:[%s5409_s5 + $0x230] sm:$0xff] }
 0x205   :  { %2336 = vmatpush1.bf16.msra.mxu1 %v3617_v42  ;;  %2418 = vmatpush1.bf16.msra.mxu0 %v3619_v43  ;;  %v3424_v42 = vcombine.high %v707_v36, %v711_v37  ;;  %v714_v43 = vld [vmem:[%s5409_s5 + $0x90] sm:$0xff]  ;;  %v763_v36 = vld [vmem:[%s5409_s5 + $0x218] sm:$0xff] }
 0x206   :  { %2337 = vmatprep.subr.bf16.mxu1 %v3626_v44  ;;  %2419 = vmatprep.subr.bf16.mxu0 %v3628_v45  ;;  %v718_v44 = vld [vmem:[%s5409_s5 + $0xb0] sm:$0xff]  ;;  %v715_v45 = vld [vmem:[%s5409_s5 + $0x98] sm:$0xff] }
 0x207   :  { %v3430_v49 = vcombine.high %v714_v43, %v718_v44  ;;  %v3429_v56 = vcombine.low %v714_v43, %v718_v44  ;;  %v3431_v59 = vcombine.low %v715_v45, %v719_v46  ;;  %v767_v37 = vld [vmem:[%s5409_s5 + $0x238] sm:$0xff]  ;;  %v770_v43 = vld [vmem:[%s5409_s5 + $0x250] sm:$0xff] }
 0x208   :  { %v774_v44 = vld [vmem:[%s5409_s5 + $0x270] sm:$0xff] }
 0x209   :  { %2338 = vmatpush1.bf16.msra.mxu1 %v3625_v50  ;;  %2420 = vmatpush1.bf16.msra.mxu0 %v3627_v53  ;;  %v3432_v50 = vcombine.high %v715_v45, %v719_v46  ;;  %v722_v53 = vld [vmem:[%s5409_s5 + $0xd0] sm:$0xff]  ;;  %v771_v45 = vld [vmem:[%s5409_s5 + $0x258] sm:$0xff] }
 0x20a   :  { %2339 = vmatprep.subr.bf16.mxu1 %v3634_v54  ;;  %2421 = vmatprep.subr.bf16.mxu0 %v3636_v55  ;;  %v726_v54 = vld [vmem:[%s5409_s5 + $0xf0] sm:$0xff]  ;;  %v723_v55 = vld [vmem:[%s5409_s5 + $0xd8] sm:$0xff] }
 0x20b   :  { %v3438_v60 = vcombine.high %v722_v53, %v726_v54  ;;  %v3437_v2 = vcombine.low %v722_v53, %v726_v54  ;;  %v775_v46 = vld [vmem:[%s5409_s5 + $0x278] sm:$0xff]  ;;  %v778_v53 = vld [vmem:[%s5409_s5 + $0x290] sm:$0xff] }
 0x20c   :  { %v782_v54 = vld [vmem:[%s5409_s5 + $0x2b0] sm:$0xff] }
 0x20d   :  { %2340 = vmatpush1.bf16.msra.mxu1 %v3633_v62  ;;  %2422 = vmatpush1.bf16.msra.mxu0 %v3635_v63  ;;  %v730_v62 = vld [vmem:[%s5409_s5 + $0x110] sm:$0xff] }
 0x20e   :  { %2341 = vmatprep.subr.bf16.mxu1 %v3642_v0  ;;  %2423 = vmatprep.subr.bf16.mxu0 %v3644_v1  ;;  %v734_v63 = vld [vmem:[%s5409_s5 + $0x130] sm:$0xff]  ;;  %v731_v0 = vld [vmem:[%s5409_s5 + $0x118] sm:$0xff] }
 0x20f   :  { %v735_v1 = vld [vmem:[%s5409_s5 + $0x138] sm:$0xff]  ;;  %v3446_v4 = vcombine.high %v730_v62, %v734_v63 }
 0x210   :  { %v3448_v5 = vcombine.high %v731_v0, %v735_v1  ;;  %v3447_v10 = vcombine.low %v731_v0, %v735_v1  ;;  %v787_v0 = vld [vmem:[%s5409_s5 + $0x2d8] sm:$0xff] }
 0x211   :  { %2342 = vmatpush1.bf16.msra.mxu1 %v3641_v7  ;;  %2424 = vmatpush1.bf16.msra.mxu0 %v3643_v8  ;;  %v742_v7 = vld [vmem:[%s5409_s5 + $0x170] sm:$0xff]  ;;  %v739_v8 = vld [vmem:[%s5409_s5 + $0x158] sm:$0xff] }
 0x212   :  { %2343 = vmatprep.subr.bf16.mxu1 %v3650_v9  ;;  %2425 = vmatprep.subr.bf16.mxu0 %v3652_v51  ;;  %v743_v9 = vld [vmem:[%s5409_s5 + $0x178] sm:$0xff]  ;;  %v3445_v51 = vcombine.low %v730_v62, %v734_v63  ;;  %v3454_v11 = vcombine.high %v738_v6, %v742_v7  ;;  %v786_v62 = vld [vmem:[%s5409_s5 + $0x2d0] sm:$0xff] }
 0x213   :  { %v3456_v13 = vcombine.high %v739_v8, %v743_v9  ;;  %v790_v63 = vld [vmem:[%s5409_s5 + $0x2f0] sm:$0xff]  ;;  %v791_v1 = vld [vmem:[%s5409_s5 + $0x2f8] sm:$0xff] }
 0x215   :  { %2344 = vmatpush1.bf16.msra.mxu1 %v3649_v17  ;;  %2426 = vmatpush1.bf16.msra.mxu0 %v3651_v18  ;;  %v747_v17 = vld [vmem:[%s5409_s5 + $0x198] sm:$0xff] }
 0x216   :  { %2345 = vmatprep.subr.bf16.mxu1 %v3658_v19  ;;  %2427 = vmatprep.subr.bf16.mxu0 %v3660_v57  ;;  %v751_v18 = vld [vmem:[%s5409_s5 + $0x1b8] sm:$0xff]  ;;  %v3453_v19 = vcombine.low %v738_v6, %v742_v7  ;;  %v3455_v57 = vcombine.low %v739_v8, %v743_v9  ;;  %v794_v6 = vld [vmem:[%s5409_s5 + $0x310] sm:$0xff] }
 0x217   :  { %v3464_v22 = vcombine.high %v747_v17, %v751_v18  ;;  %v798_v7 = vld [vmem:[%s5409_s5 + $0x330] sm:$0xff]  ;;  %v795_v8 = vld [vmem:[%s5409_s5 + $0x318] sm:$0xff] }
 0x218   :  { %v799_v9 = vld [vmem:[%s5409_s5 + $0x338] sm:$0xff] }
 0x219   :  { %2346 = vmatpush1.bf16.msra.mxu1 %v3657_v26  ;;  %2428 = vmatpush1.bf16.msra.mxu0 %v3659_v29  ;;  %v759_v26 = vld [vmem:[%s5409_s5 + $0x1f8] sm:$0xff]  ;;  %v3461_v29 = vcombine.low %v746_v15, %v750_v16  ;;  %v802_v15 = vld [vmem:[%s5409_s5 + $0x350] sm:$0xff] }
 0x21a   :  { %2438 = vmatprep.subr.bf16.mxu1 %v3414_v31  ;;  %2520 = vmatprep.subr.bf16.mxu0 %v3416_v32  ;;  %v3463_v31 = vcombine.low %v747_v17, %v751_v18  ;;  %v3470_v32 = vcombine.high %v754_v23, %v758_v24  ;;  %v3472_v33 = vcombine.high %v755_v25, %v759_v26  ;;  %v806_v16 = vld [vmem:[%s5409_s5 + $0x370] sm:$0xff]  ;;  %v803_v17 = vld [vmem:[%s5409_s5 + $0x358] sm:$0xff] }
 0x21b   :  { %v807_v18 = vld [vmem:[%s5409_s5 + $0x378] sm:$0xff] }
 0x21c   :  { %2348 = vmatmul.mubr.bf16.vlgmr.msra.gmra.mrb[4].mxu1 %v4802_v39  ;;  %2430 = vmatmul.mubr.bf16.vlgmr.msra.gmra.mrb[8].mxu0 %v4802_v39 }
 0x21d   :  { %2439 = vmatpush1.bf16.msra.mxu1 %v3413_v38  ;;  %2470 = vmatprep.mubr.bf16.mxu1 %v4593_v12  ;;  %v3469_v38 = vcombine.low %v754_v23, %v758_v24  ;;  %v810_v23 = vld [vmem:[%s5409_s5 + $0x390] sm:$0xff] }
 0x21e   :  { %2521 = vmatpush1.bf16.msra.mxu0 %v3415_v40  ;;  %2552 = vmatprep.mubr.bf16.mxu0 %v4593_v12  ;;  %v727_v12 = vld [vmem:[%s5409_s5 + $0xf8] sm:$0xff]  ;;  %v3471_v40 = vcombine.low %v755_v25, %v759_v26  ;;  %v814_v24 = vld [vmem:[%s5409_s5 + $0x3b0] sm:$0xff] }
 0x21f   :  { %2440 = vmatprep.subr.bf16.mxu1 %v3422_v41  ;;  %2522 = vmatprep.subr.bf16.mxu0 %v3424_v42  ;;  %v3440_v61 = vcombine.high %v723_v55, %v727_v12  ;;  %v3439_v3 = vcombine.low %v723_v55, %v727_v12  ;;  %v3478_v41 = vcombine.high %v762_v34, %v766_v35  ;;  %v779_v55 = vld [vmem:[%s5409_s5 + $0x298] sm:$0xff] }
 0x220   :  { %v3480_v42 = vcombine.high %v763_v36, %v767_v37  ;;  %v783_v12 = vld [vmem:[%s5409_s5 + $0x2b8] sm:$0xff] }
 0x221   :  { %2441 = vmatpush1.bf16.msra.mxu1 %v3421_v47  ;;  %v3477_v47 = vcombine.low %v762_v34, %v766_v35  ;;  %v811_v25 = vld [vmem:[%s5409_s5 + $0x398] sm:$0xff]  ;;  %v818_v34 = vld [vmem:[%s5409_s5 + $0x3d0] sm:$0xff] }
 0x222   :  { %2523 = vmatpush1.bf16.msra.mxu0 %v3423_v48  ;;  %2442 = vmatprep.subr.bf16.mxu1 %v3430_v49  ;;  %v3479_v48 = vcombine.low %v763_v36, %v767_v37  ;;  %v3486_v49 = vcombine.high %v770_v43, %v774_v44  ;;  %v815_v26 = vld [vmem:[%s5409_s5 + $0x3b8] sm:$0xff]  ;;  %v822_v35 = vld [vmem:[%s5409_s5 + $0x3f0] sm:$0xff] }
 0x223   :  { %2524 = vmatprep.subr.bf16.mxu0 %v3432_v50  ;;  %v3488_v50 = vcombine.high %v771_v45, %v775_v46  ;;  %v819_v36 = vld [vmem:[%s5409_s5 + $0x3d8] sm:$0xff] }
 0x224   :  { %v823_v37 = vld [vmem:[%s5409_s5 + $0x3f8] sm:$0xff] }
 0x225   :  { %2443 = vmatpush1.bf16.msra.mxu1 %v3429_v56  ;;  %v3485_v56 = vcombine.low %v770_v43, %v774_v44  ;;  %v826_v43 = vld [vmem:[%s5409_s5 + $0x410] sm:$0xff] }
 0x226   :  { %2525 = vmatpush1.bf16.msra.mxu0 %v3431_v59  ;;  %2444 = vmatprep.subr.bf16.mxu1 %v3438_v60  ;;  %v3487_v59 = vcombine.low %v771_v45, %v775_v46  ;;  %v3494_v60 = vcombine.high %v778_v53, %v782_v54  ;;  %v830_v44 = vld [vmem:[%s5409_s5 + $0x430] sm:$0xff]  ;;  %v827_v45 = vld [vmem:[%s5409_s5 + $0x418] sm:$0xff] }
 0x227   :  { %2526 = vmatprep.subr.bf16.mxu0 %v3440_v61  ;;  %v3496_v61 = vcombine.high %v779_v55, %v783_v12  ;;  %v831_v46 = vld [vmem:[%s5409_s5 + $0x438] sm:$0xff] }
 0x229   :  { %2445 = vmatpush1.bf16.msra.mxu1 %v3437_v2  ;;  %v3493_v2 = vcombine.low %v778_v53, %v782_v54  ;;  %v834_v53 = vld [vmem:[%s5409_s5 + $0x450] sm:$0xff] }
 0x22a   :  { %2527 = vmatpush1.bf16.msra.mxu0 %v3439_v3  ;;  %2446 = vmatprep.subr.bf16.mxu1 %v3446_v4  ;;  %v3495_v3 = vcombine.low %v779_v55, %v783_v12  ;;  %v3502_v4 = vcombine.high %v786_v62, %v790_v63  ;;  %v838_v54 = vld [vmem:[%s5409_s5 + $0x470] sm:$0xff]  ;;  %v3541_v55 = vcombine.low %v826_v43, %v830_v44  ;;  %v835_v12 = vld [vmem:[%s5409_s5 + $0x458] sm:$0xff] }
 0x22b   :  { %2528 = vmatprep.subr.bf16.mxu0 %v3448_v5  ;;  %v3504_v5 = vcombine.high %v787_v0, %v791_v1 }
 0x22d   :  { %2447 = vmatpush1.bf16.msra.mxu1 %v3445_v51  ;;  %v3501_v51 = vcombine.low %v786_v62, %v790_v63  ;;  %v846_v62 = vld [vmem:[%s5409_s5 + $0x4b0] sm:$0xff] }
 0x22e   :  { %2529 = vmatpush1.bf16.msra.mxu0 %v3447_v10  ;;  %2448 = vmatprep.subr.bf16.mxu1 %v3454_v11  ;;  %v3503_v10 = vcombine.low %v787_v0, %v791_v1  ;;  %v3510_v11 = vcombine.high %v794_v6, %v798_v7  ;;  %v843_v0 = vld [vmem:[%s5409_s5 + $0x498] sm:$0xff] }
 0x22f   :  { %2530 = vmatprep.subr.bf16.mxu0 %v3456_v13  ;;  %v3512_v13 = vcombine.high %v795_v8, %v799_v9  ;;  %v847_v1 = vld [vmem:[%s5409_s5 + $0x4b8] sm:$0xff] }
 0x231   :  { %2449 = vmatpush1.bf16.msra.mxu1 %v3453_v19  ;;  %v3509_v19 = vcombine.low %v794_v6, %v798_v7  ;;  %v850_v6 = vld [vmem:[%s5409_s5 + $0x4d0] sm:$0xff] }
 0x232   :  { %2531 = vmatpush1.bf16.msra.mxu0 %v3455_v57  ;;  %2450 = vmatprep.subr.bf16.mxu1 %v3462_v20  ;;  %v3511_v57 = vcombine.low %v795_v8, %v799_v9  ;;  %v3518_v20 = vcombine.high %v802_v15, %v806_v16  ;;  %v854_v7 = vld [vmem:[%s5409_s5 + $0x4f0] sm:$0xff]  ;;  %v855_v8 = vld [vmem:[%s5409_s5 + $0x4f8] sm:$0xff]  ;;  %v3559_v9 = vcombine.low %v843_v0, %v847_v1 }
 0x233   :  { %2532 = vmatprep.subr.bf16.mxu0 %v3464_v22  ;;  %v3520_v22 = vcombine.high %v803_v17, %v807_v18 }
 0x235   :  { %2451 = vmatpush1.bf16.msra.mxu1 %v3461_v29  ;;  %v3517_v29 = vcombine.low %v802_v15, %v806_v16  ;;  %v859_v15 = vld [vmem:[%s5409_s5 + $0x518] sm:$0xff] }
 0x236   :  { %2533 = vmatpush1.bf16.msra.mxu0 %v3463_v31  ;;  %2452 = vmatprep.subr.bf16.mxu1 %v3470_v32  ;;  %v3519_v31 = vcombine.low %v803_v17, %v807_v18  ;;  %v3526_v32 = vcombine.high %v810_v23, %v814_v24  ;;  %v863_v16 = vld [vmem:[%s5409_s5 + $0x538] sm:$0xff]  ;;  %v3565_v17 = vcombine.low %v850_v6, %v854_v7 }
 0x237   :  { %2534 = vmatprep.subr.bf16.mxu0 %v3472_v33  ;;  %v3528_v33 = vcombine.high %v811_v25, %v815_v26 }
 0x239   :  { %2453 = vmatpush1.bf16.msra.mxu1 %v3469_v38  ;;  %v3525_v38 = vcombine.low %v810_v23, %v814_v24  ;;  %v867_v23 = vld [vmem:[%s5409_s5 + $0x558] sm:$0xff] }
 0x23a   :  { %2535 = vmatpush1.bf16.msra.mxu0 %v3471_v40  ;;  %2454 = vmatprep.subr.bf16.mxu1 %v3478_v41  ;;  %v3527_v40 = vcombine.low %v811_v25, %v815_v26  ;;  %v3534_v41 = vcombine.high %v818_v34, %v822_v35  ;;  %v871_v24 = vld [vmem:[%s5409_s5 + $0x578] sm:$0xff]  ;;  %v3575_v26 = vcombine.low %v859_v15, %v863_v16 }
 0x23b   :  { %2536 = vmatprep.subr.bf16.mxu0 %v3480_v42  ;;  %v3536_v42 = vcombine.high %v819_v36, %v823_v37 }
 0x23d   :  { %2455 = vmatpush1.bf16.msra.mxu1 %v3477_v47  ;;  %v3533_v47 = vcombine.low %v818_v34, %v822_v35  ;;  %v875_v34 = vld [vmem:[%s5409_s5 + $0x598] sm:$0xff] }
 0x23e   :  { %2537 = vmatpush1.bf16.msra.mxu0 %v3479_v48  ;;  %2456 = vmatprep.subr.bf16.mxu1 %v3486_v49  ;;  %v3535_v48 = vcombine.low %v819_v36, %v823_v37  ;;  %v3542_v49 = vcombine.high %v826_v43, %v830_v44  ;;  %v879_v35 = vld [vmem:[%s5409_s5 + $0x5b8] sm:$0xff]  ;;  %v3583_v37 = vcombine.low %v867_v23, %v871_v24 }
 0x23f   :  { %2538 = vmatprep.subr.bf16.mxu0 %v3488_v50  ;;  %v3544_v50 = vcombine.high %v827_v45, %v831_v46  ;;  %v883_v43 = vld [vmem:[%s5409_s5 + $0x5d8] sm:$0xff] }
 0x240   :  { %v887_v44 = vld [vmem:[%s5409_s5 + $0x5f8] sm:$0xff] }
 0x241   :  { %2457 = vmatpush1.bf16.msra.mxu1 %v3485_v56  ;;  %v839_v56 = vld [vmem:[%s5409_s5 + $0x478] sm:$0xff] }
 0x242   :  { %2539 = vmatpush1.bf16.msra.mxu0 %v3487_v59  ;;  %2458 = vmatprep.subr.bf16.mxu1 %v3494_v60  ;;  %v3543_v59 = vcombine.low %v827_v45, %v831_v46  ;;  %v3550_v60 = vcombine.high %v834_v53, %v838_v54  ;;  %v3552_v63 = vcombine.high %v835_v12, %v839_v56 }
 0x243   :  { %2540 = vmatprep.subr.bf16.mxu0 %v3496_v61  ;;  %v842_v61 = vld [vmem:[%s5409_s5 + $0x490] sm:$0xff]  ;;  %v3591_v46 = vcombine.low %v875_v34, %v879_v35 }
 0x245   :  { %2459 = vmatpush1.bf16.msra.mxu1 %v3493_v2  ;;  %v3549_v2 = vcombine.low %v834_v53, %v838_v54  ;;  %v891_v53 = vld [vmem:[%s5409_s5 + $0x618] sm:$0xff] }
 0x246   :  { %2541 = vmatpush1.bf16.msra.mxu0 %v3495_v3  ;;  %2460 = vmatprep.subr.bf16.mxu1 %v3502_v4  ;;  %v3551_v3 = vcombine.low %v835_v12, %v839_v56  ;;  %v3558_v4 = vcombine.high %v842_v61, %v846_v62  ;;  %v895_v54 = vld [vmem:[%s5409_s5 + $0x638] sm:$0xff]  ;;  %v3599_v12 = vcombine.low %v883_v43, %v887_v44 }
 0x247   :  { %2542 = vmatprep.subr.bf16.mxu0 %v3504_v5  ;;  %v3560_v5 = vcombine.high %v843_v0, %v847_v1  ;;  %v3607_v1 = vcombine.low %v891_v53, %v895_v54 }
 0x249   :  { %2461 = vmatpush1.bf16.msra.mxu1 %v3501_v51  ;;  %v3566_v51 = vcombine.high %v850_v6, %v854_v7  ;;  %v907_v6 = vld [vmem:[%s5409_s5 + $0x698] sm:$0xff] }
 0x24a   :  { %2543 = vmatpush1.bf16.msra.mxu0 %v3503_v10  ;;  %2462 = vmatprep.subr.bf16.mxu1 %v3510_v11  ;;  %v858_v11 = vld [vmem:[%s5409_s5 + $0x510] sm:$0xff]  ;;  %v911_v7 = vld [vmem:[%s5409_s5 + $0x6b8] sm:$0xff] }
 0x24b   :  { %2544 = vmatprep.subr.bf16.mxu0 %v3512_v13  ;;  %v862_v13 = vld [vmem:[%s5409_s5 + $0x530] sm:$0xff] }
 0x24c   :  { %v3573_v25 = vcombine.low %v858_v11, %v862_v13 }
 0x24d   :  { %2463 = vmatpush1.bf16.msra.mxu1 %v3509_v19  ;;  %v3574_v19 = vcombine.high %v858_v11, %v862_v13  ;;  %v915_v11 = vld [vmem:[%s5409_s5 + $0x6d8] sm:$0xff] }
 0x24e   :  { %2545 = vmatpush1.bf16.msra.mxu0 %v3511_v57  ;;  %2464 = vmatprep.subr.bf16.mxu1 %v3518_v20  ;;  %v3576_v57 = vcombine.high %v859_v15, %v863_v16  ;;  %v866_v20 = vld [vmem:[%s5409_s5 + $0x550] sm:$0xff]  ;;  %v919_v13 = vld [vmem:[%s5409_s5 + $0x6f8] sm:$0xff]  ;;  %v3623_v16 = vcombine.low %v907_v6, %v911_v7 }
 0x24f   :  { %2546 = vmatprep.subr.bf16.mxu0 %v3520_v22  ;;  %v870_v22 = vld [vmem:[%s5409_s5 + $0x570] sm:$0xff] }
 0x250   :  { %v3581_v36 = vcombine.low %v866_v20, %v870_v22 }
 0x251   :  { %2465 = vmatpush1.bf16.msra.mxu1 %v3517_v29  ;;  %v3582_v29 = vcombine.high %v866_v20, %v870_v22  ;;  %v923_v20 = vld [vmem:[%s5409_s5 + $0x718] sm:$0xff] }
 0x252   :  { %2547 = vmatpush1.bf16.msra.mxu0 %v3519_v31  ;;  %2466 = vmatprep.subr.bf16.mxu1 %v3526_v32  ;;  %v3584_v31 = vcombine.high %v867_v23, %v871_v24  ;;  %v874_v32 = vld [vmem:[%s5409_s5 + $0x590] sm:$0xff]  ;;  %v927_v22 = vld [vmem:[%s5409_s5 + $0x738] sm:$0xff]  ;;  %v3631_v24 = vcombine.low %v915_v11, %v919_v13 }
 0x253   :  { %2548 = vmatprep.subr.bf16.mxu0 %v3528_v33  ;;  %v878_v33 = vld [vmem:[%s5409_s5 + $0x5b0] sm:$0xff] }
 0x254   :  { %v3589_v45 = vcombine.low %v874_v32, %v878_v33 }
 0x255   :  { %2467 = vmatpush1.bf16.msra.mxu1 %v3525_v38  ;;  %v3590_v38 = vcombine.high %v874_v32, %v878_v33  ;;  %v931_v32 = vld [vmem:[%s5409_s5 + $0x758] sm:$0xff] }
 0x256   :  { %2549 = vmatpush1.bf16.msra.mxu0 %v3527_v40  ;;  %2468 = vmatprep.subr.bf16.mxu1 %v3534_v41  ;;  %v3592_v40 = vcombine.high %v875_v34, %v879_v35  ;;  %v882_v41 = vld [vmem:[%s5409_s5 + $0x5d0] sm:$0xff]  ;;  %v935_v33 = vld [vmem:[%s5409_s5 + $0x778] sm:$0xff]  ;;  %v3639_v35 = vcombine.low %v923_v20, %v927_v22 }
 0x257   :  { %2550 = vmatprep.subr.bf16.mxu0 %v3536_v42  ;;  %v886_v42 = vld [vmem:[%s5409_s5 + $0x5f0] sm:$0xff] }
 0x259   :  { %2469 = vmatpush1.bf16.msra.mxu1 %v3533_v47  ;;  %v3598_v47 = vcombine.high %v882_v41, %v886_v42 }
 0x25a   :  { %2551 = vmatpush1.bf16.msra.mxu0 %v3535_v48  ;;  %2479 = vmatprep.subr.bf16.mxu1 %v3542_v49  ;;  %v3600_v48 = vcombine.high %v883_v43, %v887_v44  ;;  %v890_v49 = vld [vmem:[%s5409_s5 + $0x610] sm:$0xff]  ;;  %v3647_v44 = vcombine.low %v931_v32, %v935_v33 }
 0x25b   :  { %2561 = vmatprep.subr.bf16.mxu0 %v3544_v50  ;;  %v894_v50 = vld [vmem:[%s5409_s5 + $0x630] sm:$0xff] }
 0x25c   :  { %2471 = vmatmul.mubr.bf16.vlgmr.msra.gmra.mrb[8].mxu1 %v4595_v14  ;;  %v3606_v56 = vcombine.high %v890_v49, %v894_v50  ;;  %v3605_v0 = vcombine.low %v890_v49, %v894_v50  ;;  %v947_v49 = vld [vmem:[%s5409_s5 + $0x7d8] sm:$0xff] }
 0x25d   :  { %2553 = vmatmul.mubr.bf16.vlgmr.msra.gmra.mrb[12].mxu0 %v4595_v14  ;;  %2480 = vmatpush1.bf16.msra.mxu1 %v3541_v55  ;;  %v851_v14 = vld [vmem:[%s5409_s5 + $0x4d8] sm:$0xff]  ;;  %v3597_v55 = vcombine.low %v882_v41, %v886_v42 }
 0x25e   :  { %2511 = vmatprep.mubr.bf16.mxu1 %v4611_v21  ;;  %2562 = vmatpush1.bf16.msra.mxu0 %v3543_v59  ;;  %v3568_v10 = vcombine.high %v851_v14, %v855_v8  ;;  %v3567_v18 = vcombine.low %v851_v14, %v855_v8  ;;  %v3608_v59 = vcombine.high %v891_v53, %v895_v54  ;;  %v939_v41 = vld [vmem:[%s5409_s5 + $0x798] sm:$0xff] }
 0x25f   :  { %2593 = vmatprep.mubr.bf16.mxu0 %v4611_v21  ;;  %2481 = vmatprep.subr.bf16.mxu1 %v3550_v60  ;;  %v3557_v21 = vcombine.low %v842_v61, %v846_v62  ;;  %v898_v60 = vld [vmem:[%s5409_s5 + $0x650] sm:$0xff]  ;;  %v899_v62 = vld [vmem:[%s5409_s5 + $0x658] sm:$0xff] }
 0x260   :  { %2563 = vmatprep.subr.bf16.mxu0 %v3552_v63  ;;  %v902_v61 = vld [vmem:[%s5409_s5 + $0x670] sm:$0xff]  ;;  %v903_v63 = vld [vmem:[%s5409_s5 + $0x678] sm:$0xff] }
 0x261   :  { %2482 = vmatpush1.bf16.msra.mxu1 %v3549_v2  ;;  %v3614_v2 = vcombine.high %v898_v60, %v902_v61  ;;  %v3613_v14 = vcombine.low %v898_v60, %v902_v61  ;;  %v3615_v8 = vcombine.low %v899_v62, %v903_v63  ;;  %v943_v42 = vld [vmem:[%s5409_s5 + $0x7b8] sm:$0xff]  ;;  %v3964_v60 = vld [vmem:[%s5411_s7 + $0x40] sm:$0xff]  }
 0x262   :  { %2564 = vmatpush1.bf16.msra.mxu0 %v3551_v3  ;;  %2483 = vmatprep.subr.bf16.mxu1 %v3558_v4  ;;  %v3616_v3 = vcombine.high %v899_v62, %v903_v63  ;;  %v906_v4 = vld [vmem:[%s5409_s5 + $0x690] sm:$0xff]  ;;  %v951_v50 = vld [vmem:[%s5409_s5 + $0x7f8] sm:$0xff]  ;;  %v3655_v54 = vcombine.low %v939_v41, %v943_v42  ;;  %v3965_v61 = vld [vmem:[%s5411_s7 + $0xc0] sm:$0xff]  }
 0x263   :  { %2565 = vmatprep.subr.bf16.mxu0 %v3560_v5  ;;  %v910_v5 = vld [vmem:[%s5409_s5 + $0x6b0] sm:$0xff]  ;;  %v3966_v62 = vld [vmem:[%s5411_s7] sm:$0xff]  }
 0x264   :  { %v3621_v15 = vcombine.low %v906_v4, %v910_v5  ;;  %v3967_v63 = vld [vmem:[%s5411_s7 + $0x80] sm:$0xff]  }
 0x265   :  { %2484 = vmatpush1.bf16.msra.mxu1 %v3557_v21  ;;  %v3622_v21 = vcombine.high %v906_v4, %v910_v5  ;;  %v3972_v4 = vld [vmem:[%s5411_s7 + $0x50] sm:$0xff]  }
 0x266   :  { %2566 = vmatpush1.bf16.msra.mxu0 %v3559_v9  ;;  %2485 = vmatprep.subr.bf16.mxu1 %v3566_v51  ;;  %v3624_v9 = vcombine.high %v907_v6, %v911_v7  ;;  %v914_v51 = vld [vmem:[%s5409_s5 + $0x6d0] sm:$0xff]  ;;  %v3976_v7 = vld [vmem:[%s5411_s7 + $0x58] sm:$0xff]  }
 0x267   :  { %2567 = vmatprep.subr.bf16.mxu0 %v3568_v10  ;;  %v918_v10 = vld [vmem:[%s5409_s5 + $0x6f0] sm:$0xff] }
 0x268   :  { %v3629_v23 = vcombine.low %v914_v51, %v918_v10  ;;  %v3974_v5 = vld [vmem:[%s5411_s7 + $0x10] sm:$0xff]  }
 0x269   :  { %2486 = vmatpush1.bf16.msra.mxu1 %v3565_v17  ;;  %v3630_v17 = vcombine.high %v914_v51, %v918_v10  ;;  %v3975_v6 = vld [vmem:[%s5411_s7 + $0x90] sm:$0xff]   ;;  %v3981_v51 = vld [vmem:[%s5411_s7 + $0xe0] sm:$0xff]  }
 0x26a   :  { %2568 = vmatpush1.bf16.msra.mxu0 %v3567_v18  ;;  %2487 = vmatprep.subr.bf16.mxu1 %v3574_v19  ;;  %v3632_v18 = vcombine.high %v915_v11, %v919_v13  ;;  %v922_v19 = vld [vmem:[%s5409_s5 + $0x710] sm:$0xff]  ;;  %v3982_v10 = vld [vmem:[%s5411_s7 + $0x20] sm:$0xff]   ;;  %v3984_v13 = vld [vmem:[%s5411_s7 + $0x68] sm:$0xff]  }
 0x26b   :  { %2569 = vmatprep.subr.bf16.mxu0 %v3576_v57  ;;  %v926_v57 = vld [vmem:[%s5409_s5 + $0x730] sm:$0xff]  ;;  %v3983_v11 = vld [vmem:[%s5411_s7 + $0xa0] sm:$0xff]  }
 0x26c   :  { %v3637_v34 = vcombine.low %v922_v19, %v926_v57 }
 0x26d   :  { %2488 = vmatpush1.bf16.msra.mxu1 %v3573_v25  ;;  %v3638_v25 = vcombine.high %v922_v19, %v926_v57  ;;  %v3989_v19 = vld [vmem:[%s5411_s7 + $0xf0] sm:$0xff]  }
 0x26e   :  { %2570 = vmatpush1.bf16.msra.mxu0 %v3575_v26  ;;  %2489 = vmatprep.subr.bf16.mxu1 %v3582_v29  ;;  %v3640_v26 = vcombine.high %v923_v20, %v927_v22  ;;  %v930_v29 = vld [vmem:[%s5409_s5 + $0x750] sm:$0xff]  ;;  %v3992_v22 = vld [vmem:[%s5411_s7 + $0x78] sm:$0xff]  }
 0x26f   :  { %2571 = vmatprep.subr.bf16.mxu0 %v3584_v31  ;;  %v934_v31 = vld [vmem:[%s5409_s5 + $0x770] sm:$0xff] }
 0x270   :  { %v3645_v43 = vcombine.low %v930_v29, %v934_v31  ;;  %v3990_v57 = vld [vmem:[%s5411_s7 + $0x30] sm:$0xff]  }
 0x271   :  { %2490 = vmatpush1.bf16.msra.mxu1 %v3581_v36  ;;  %v3646_v36 = vcombine.high %v930_v29, %v934_v31  ;;  %v3991_v20 = vld [vmem:[%s5411_s7 + $0xb0] sm:$0xff]   ;;  %v3997_v29 = vld [vmem:[%s5411_s7 + $0x1c0] sm:$0xff]  }
 0x272   :  { %2572 = vmatpush1.bf16.msra.mxu0 %v3583_v37  ;;  %2491 = vmatprep.subr.bf16.mxu1 %v3590_v38  ;;  %v3648_v37 = vcombine.high %v931_v32, %v935_v33  ;;  %v938_v38 = vld [vmem:[%s5409_s5 + $0x790] sm:$0xff]  ;;  %v5279_v31 = vld [vmem:[%s5410_s6] sm:$0xff] }
 0x273   :  { %2573 = vmatprep.subr.bf16.mxu0 %v3592_v40  ;;  %v942_v40 = vld [vmem:[%s5409_s5 + $0x7b0] sm:$0xff]  ;;  %v957_v32 = vrot.slane %v5279_v31, %v4364_v28  ;;  %v965_v33 = vrot.slane %v5279_v31, %v268_v58 }
 0x274   :  { %v3653_v53 = vcombine.low %v938_v38, %v942_v40 }
 0x275   :  { %2492 = vmatpush1.bf16.msra.mxu1 %v3589_v45  ;;  %v3654_v45 = vcombine.high %v938_v38, %v942_v40 }
 0x276   :  { %2574 = vmatpush1.bf16.msra.mxu0 %v3591_v46  ;;  %2493 = vmatprep.subr.bf16.mxu1 %v3598_v47  ;;  %v3656_v46 = vcombine.high %v939_v41, %v943_v42  ;;  %v946_v47 = vld [vmem:[%s5409_s5 + $0x7d0] sm:$0xff] }
 0x277   :  { %2575 = vmatprep.subr.bf16.mxu0 %v3600_v48  ;;  %v950_v48 = vld [vmem:[%s5409_s5 + $0x7f0] sm:$0xff] }
 0x279   :  { %2494 = vmatpush1.bf16.msra.mxu1 %v3597_v55  ;;  %v3662_v55 = vcombine.high %v946_v47, %v950_v48 }
 0x27a   :  { %2576 = vmatpush1.bf16.msra.mxu0 %v3599_v12  ;;  %2495 = vmatprep.subr.bf16.mxu1 %v3606_v56  ;;  %v3664_v12 = vcombine.high %v947_v49, %v951_v50  ;;  %v3661_v56 = vcombine.low %v946_v47, %v950_v48 }
 0x27b   :  { %2577 = vmatprep.subr.bf16.mxu0 %v3608_v59  ;;  %v3663_v59 = vcombine.low %v947_v49, %v951_v50 }
 0x27d   :  { %2496 = vmatpush1.bf16.msra.mxu1 %v3605_v0  ;;  %v3968_v0 = vld [vmem:[%s5411_s7 + $0x48] sm:$0xff]  }
 0x27e   :  { %2578 = vmatpush1.bf16.msra.mxu0 %v3607_v1  ;;  %2497 = vmatprep.subr.bf16.mxu1 %v3614_v2  ;;  %v3969_v1 = vld [vmem:[%s5411_s7 + $0xc8] sm:$0xff]  }
 0x27f   :  { %2579 = vmatprep.subr.bf16.mxu0 %v3616_v3  ;;  %v3970_v2 = vld [vmem:[%s5411_s7 + $0x8] sm:$0xff]  }
 0x280   :  { %v3971_v3 = vld [vmem:[%s5411_s7 + $0x88] sm:$0xff]  }
 0x281   :  { %2498 = vmatpush1.bf16.msra.mxu1 %v3613_v14  ;;  %v3977_v14 = vld [vmem:[%s5411_s7 + $0xd8] sm:$0xff]  }
 0x282   :  { %2580 = vmatpush1.bf16.msra.mxu0 %v3615_v8  ;;  %2499 = vmatprep.subr.bf16.mxu1 %v3622_v21  ;;  %v3978_v8 = vld [vmem:[%s5411_s7 + $0x18] sm:$0xff]  }
 0x283   :  { %2581 = vmatprep.subr.bf16.mxu0 %v3624_v9  ;;  %v3979_v21 = vld [vmem:[%s5411_s7 + $0x98] sm:$0xff]   ;;  %v3980_v9 = vld [vmem:[%s5411_s7 + $0x60] sm:$0xff]  }
 0x285   :  { %2500 = vmatpush1.bf16.msra.mxu1 %v3621_v15  ;;  %v3985_v15 = vld [vmem:[%s5411_s7 + $0xe8] sm:$0xff]  }
 0x286   :  { %2582 = vmatpush1.bf16.msra.mxu0 %v3623_v16  ;;  %2501 = vmatprep.subr.bf16.mxu1 %v3630_v17  ;;  %v3986_v16 = vld [vmem:[%s5411_s7 + $0x28] sm:$0xff]  }
 0x287   :  { %2583 = vmatprep.subr.bf16.mxu0 %v3632_v18  ;;  %v3987_v17 = vld [vmem:[%s5411_s7 + $0xa8] sm:$0xff]   ;;  %v3988_v18 = vld [vmem:[%s5411_s7 + $0x70] sm:$0xff]  }
 0x289   :  { %2502 = vmatpush1.bf16.msra.mxu1 %v3629_v23  ;;  %v3993_v23 = vld [vmem:[%s5411_s7 + $0xf8] sm:$0xff]  }
 0x28a   :  { %2584 = vmatpush1.bf16.msra.mxu0 %v3631_v24  ;;  %2503 = vmatprep.subr.bf16.mxu1 %v3638_v25  ;;  %v3994_v24 = vld [vmem:[%s5411_s7 + $0x38] sm:$0xff]  }
 0x28b   :  { %2585 = vmatprep.subr.bf16.mxu0 %v3640_v26  ;;  %v3995_v25 = vld [vmem:[%s5411_s7 + $0xb8] sm:$0xff]   ;;  %v3996_v26 = vld [vmem:[%s5411_s7 + $0x140] sm:$0xff]  }
 0x28d   :  { %2504 = vmatpush1.bf16.msra.mxu1 %v3637_v34  ;;  %v961_v34 = vrot.slane %v5279_v31, %v4370_v30 }
 0x28e   :  { %2586 = vmatpush1.bf16.msra.mxu0 %v3639_v35  ;;  %2505 = vmatprep.subr.bf16.mxu1 %v3646_v36  ;;  %v969_v35 = vrot.slane %v5279_v31, %v272_v52 }
 0x28f   :  { %2587 = vmatprep.subr.bf16.mxu0 %v3648_v37 }
 0x291   :  { %2506 = vmatpush1.bf16.msra.mxu1 %v3645_v43 }
 0x292   :  { %2588 = vmatpush1.bf16.msra.mxu0 %v3647_v44  ;;  %2507 = vmatprep.subr.bf16.mxu1 %v3654_v45 }
 0x293   :  { %2589 = vmatprep.subr.bf16.mxu0 %v3656_v46 }
 0x295   :  { %2508 = vmatpush1.bf16.msra.mxu1 %v3653_v53 }
 0x296   :  { %2590 = vmatpush1.bf16.msra.mxu0 %v3655_v54  ;;  %2509 = vmatprep.subr.bf16.mxu1 %v3662_v55 }
 0x297   :  { %2591 = vmatprep.subr.bf16.mxu0 %v3664_v12 }
 0x299   :  { %2510 = vmatpush1.bf16.msra.mxu1 %v3661_v56  ;;  %v3998_v56 = vld [vmem:[%s5411_s7 + $0x100] sm:$0xff]  }
 0x29a   :  { %2592 = vmatpush1.bf16.msra.mxu0 %v3663_v59  ;;  %3730 = vmatprep.subr.bf16.mxu1 %v3964_v60  ;;  %v3999_v59 = vld [vmem:[%s5411_s7 + $0x180] sm:$0xff]  }
 0x29b   :  { %3752 = vmatprep.subr.bf16.mxu0 %v3965_v61 }
 0x29c   :  { %2512 = vmatmul.mubr.bf16.vlgmr.msra.gmra.mrb[8].mxu1 %v4802_v39 }
 0x29d   :  { %2594 = vmatmul.mubr.bf16.vlgmr.msra.gmra.mrb[12].mxu0 %v4802_v39  ;;  %3731 = vmatpush3.bf16.msra.mxu1 %v3966_v62  ;;  %v3973_v39 = vld [vmem:[%s5411_s7 + $0xd0] sm:$0xff]   ;;  %v4000_v62 = vld [vmem:[%s5411_s7 + $0x148] sm:$0xff]  }
 0x29e   :  { %3753 = vmatpush3.bf16.msra.mxu0 %v3967_v63  ;;  %3732 = vmatprep.subr.bf16.mxu1 %v3968_v0  ;;  %v4001_v63 = vld [vmem:[%s5411_s7 + $0x1c8] sm:$0xff]  }
 0x29f   :  { %3754 = vmatprep.subr.bf16.mxu0 %v3969_v1  ;;  %v4002_v0 = vld [vmem:[%s5411_s7 + $0x108] sm:$0xff]  }
 0x2a0   :  { %v4003_v1 = vld [vmem:[%s5411_s7 + $0x188] sm:$0xff]  }
 0x2a1   :  { %3733 = vmatpush3.bf16.msra.mxu1 %v3970_v2  ;;  %v4004_v2 = vld [vmem:[%s5411_s7 + $0x150] sm:$0xff]  }
 0x2a2   :  { %3755 = vmatpush3.bf16.msra.mxu0 %v3971_v3  ;;  %3734 = vmatprep.subr.bf16.mxu1 %v3972_v4  ;;  %v4005_v3 = vld [vmem:[%s5411_s7 + $0x1d0] sm:$0xff]  }
 0x2a3   :  { %3756 = vmatprep.subr.bf16.mxu0 %v3973_v39  ;;  %v4006_v4 = vld [vmem:[%s5411_s7 + $0x110] sm:$0xff]  }
 0x2a4   :  { %v4007_v39 = vld [vmem:[%s5411_s7 + $0x190] sm:$0xff]  }
 0x2a5   :  { %3735 = vmatpush3.bf16.msra.mxu1 %v3974_v5  ;;  %v4008_v5 = vld [vmem:[%s5411_s7 + $0x158] sm:$0xff]  }
 0x2a6   :  { %3757 = vmatpush3.bf16.msra.mxu0 %v3975_v6  ;;  %3736 = vmatprep.subr.bf16.mxu1 %v3976_v7  ;;  %v4009_v6 = vld [vmem:[%s5411_s7 + $0x1d8] sm:$0xff]  }
 0x2a7   :  { %3758 = vmatprep.subr.bf16.mxu0 %v3977_v14  ;;  %v4010_v7 = vld [vmem:[%s5411_s7 + $0x118] sm:$0xff]  }
 0x2a8   :  { %v4011_v14 = vld [vmem:[%s5411_s7 + $0x198] sm:$0xff]  }
 0x2a9   :  { %3737 = vmatpush3.bf16.msra.mxu1 %v3978_v8  ;;  %v4012_v8 = vld [vmem:[%s5411_s7 + $0x160] sm:$0xff]  }
 0x2aa   :  { %3759 = vmatpush3.bf16.msra.mxu0 %v3979_v21  ;;  %3738 = vmatprep.subr.bf16.mxu1 %v3980_v9  ;;  %v4013_v21 = vld [vmem:[%s5411_s7 + $0x1e0] sm:$0xff]  }
 0x2ab   :  { %3760 = vmatprep.subr.bf16.mxu0 %v3981_v51  ;;  %v4014_v9 = vld [vmem:[%s5411_s7 + $0x120] sm:$0xff]  }
 0x2ac   :  { %v4015_v51 = vld [vmem:[%s5411_s7 + $0x1a0] sm:$0xff]  }
 0x2ad   :  { %3739 = vmatpush3.bf16.msra.mxu1 %v3982_v10  ;;  %v4016_v10 = vld [vmem:[%s5411_s7 + $0x168] sm:$0xff]  }
 0x2ae   :  { %3761 = vmatpush3.bf16.msra.mxu0 %v3983_v11  ;;  %3740 = vmatprep.subr.bf16.mxu1 %v3984_v13  ;;  %v4017_v11 = vld [vmem:[%s5411_s7 + $0x1e8] sm:$0xff]  }
 0x2af   :  { %3762 = vmatprep.subr.bf16.mxu0 %v3985_v15  ;;  %v4018_v13 = vld [vmem:[%s5411_s7 + $0x128] sm:$0xff]  }
 0x2b0   :  { %v4019_v15 = vld [vmem:[%s5411_s7 + $0x1a8] sm:$0xff]  }
 0x2b1   :  { %3741 = vmatpush3.bf16.msra.mxu1 %v3986_v16  ;;  %v4020_v16 = vld [vmem:[%s5411_s7 + $0x170] sm:$0xff]  }
 0x2b2   :  { %3763 = vmatpush3.bf16.msra.mxu0 %v3987_v17  ;;  %3742 = vmatprep.subr.bf16.mxu1 %v3988_v18  ;;  %v4021_v17 = vld [vmem:[%s5411_s7 + $0x1f0] sm:$0xff]  }
 0x2b3   :  { %3764 = vmatprep.subr.bf16.mxu0 %v3989_v19  ;;  %v4022_v18 = vld [vmem:[%s5411_s7 + $0x130] sm:$0xff]  }
 0x2b4   :  { %v4023_v19 = vld [vmem:[%s5411_s7 + $0x1b0] sm:$0xff]  }
 0x2b5   :  { %3743 = vmatpush3.bf16.msra.mxu1 %v3990_v57  ;;  %v4024_v57 = vld [vmem:[%s5411_s7 + $0x178] sm:$0xff]  }
 0x2b6   :  { %3765 = vmatpush3.bf16.msra.mxu0 %v3991_v20  ;;  %3744 = vmatprep.subr.bf16.mxu1 %v3992_v22  ;;  %v4025_v20 = vld [vmem:[%s5411_s7 + $0x1f8] sm:$0xff]  }
 0x2b7   :  { %3766 = vmatprep.subr.bf16.mxu0 %v3993_v23  ;;  %v4026_v22 = vld [vmem:[%s5411_s7 + $0x138] sm:$0xff]  }
 0x2b8   :  { %v4027_v23 = vld [vmem:[%s5411_s7 + $0x1b8] sm:$0xff]  }
 0x2b9   :  { %3745 = vmatpush3.bf16.msra.mxu1 %v3994_v24  ;;  %v972_v24 = vsub.s32 4, %v4361_v27 }
 0x2ba   :  { %3767 = vmatpush3.bf16.msra.mxu0 %v3995_v25  ;;  %3774 = vmatprep.subr.bf16.mxu1 %v3996_v26  ;;  %v980_v25 = vsub.s32 6, %v4361_v27  ;;  %v976_v26 = vsub.s32 5, %v4361_v27 }
 0x2bb   :  { %3796 = vmatprep.subr.bf16.mxu0 %v3997_v29  ;;  %v984_v29 = vsub.s32 7, %v4361_v27 }
 0x2ef   :  { %v2349_v36 = vpop.f32.mrb[4].mxu1  ;;  %v2431_v37 = vpop.f32.mrb[8].mxu0 }
 0x2f0   :  { %v3818_v38 = vadd.f32 %v2349_v36, %v957_v32  ;;  %v3820_v40 = vadd.f32 %v2431_v37, %v965_v33  ;;  %v2351_v41 = vpop.f32.mrb[5].mxu1  ;;  %v2433_v42 = vpop.f32.mrb[9].mxu0  ;;  %v973_v32 = vrot.slane %v5279_v31, %v972_v24  ;;  %v981_v33 = vrot.slane %v5279_v31, %v980_v25 }
 0x2f1   :  { %v3819_v43 = vadd.f32 %v2351_v41, %v961_v34  ;;  %v3821_v44 = vadd.f32 %v2433_v42, %v969_v35  ;;  %v2353_v28 = vpop.f32.mrb[6].mxu1  ;;  %v2435_v45 = vpop.f32.mrb[10].mxu0  ;;  %v977_v34 = vrot.slane %v5279_v31, %v976_v26  ;;  %v985_v35 = vrot.slane %v5279_v31, %v984_v29 }
 0x2f2   :  { %vm2602_vm6 = vcmp.gt.f32.partialorder %v3818_v38, 0.0  ;;  %v2610_v46 = vmul.f32 0.2, %v3818_v38  ;;  %vm2604_vm7 = vcmp.gt.f32.partialorder %v3820_v40, 0.0  ;;  %v2612_v58 = vmul.f32 0.2, %v3820_v40 }
 0x2f3   :  { %vm2603_vm8 = vcmp.gt.f32.partialorder %v3819_v43, 0.0  ;;  %v2611_v30 = vmul.f32 0.2, %v3819_v43  ;;  %vm2605_vm9 = vcmp.gt.f32.partialorder %v3821_v44, 0.0  ;;  %v2613_v47 = vmul.f32 0.2, %v3821_v44 }
 0x2f4   :  { %v2618_v48 = vsel %vm2602_vm6, %v3818_v38, %v2610_v46  ;;  %v2620_v52 = vsel %vm2604_vm7, %v3820_v40, %v2612_v58  ;;  %v2354_v49 = vpop.f32.mrb[7].mxu1  ;;  %v2436_v50 = vpop.f32.mrb[11].mxu0 }
 0x2f5   :  { %v2619_v53 = vsel %vm2603_vm8, %v3819_v43, %v2611_v30  ;;  %v2621_v54 = vsel %vm2605_vm9, %v3821_v44, %v2613_v47  ;;  %v2626_v60 = vpack.c.bf16 %v2618_v48, %v2618_v48  ;;  %v2628_v61 = vpack.c.bf16 %v2620_v52, %v2620_v52 }
 0x2f6   :  { %v2627_v55 = vpack.c.bf16 %v2619_v53, %v2619_v53  ;;  %v2629_v12 = vpack.c.bf16 %v2621_v54, %v2621_v54 }
 0x2f8   :  { %3185 = vmatprep.mubr.bf16.mxu1 %v2627_v55  ;;  %3225 = vmatprep.mubr.bf16.mxu0 %v2629_v12 }
 0x2f9   :  { %3186 = vmatmul.mubr.bf16.vlgmr.msra.gmra.mrb[12].mxu1 %v2626_v60  ;;  %3226 = vmatmul.mubr.bf16.vlgmr.msra.gmra.mrb[16].mxu0 %v2628_v61  ;;  %v3665_v60 = vld [vmem:[%s5412_s8] ss:$0 sm:$0xff]  ;;  %s4055_s8 = smov [#allocation2]  }
 0x2fa   :  { %3775 = vmatpush3.bf16.msra.mxu1 %v3998_v56  ;;  %3797 = vmatpush3.bf16.msra.mxu0 %v3999_v59  ;;  %s3321_s30 = sshll.u32 %s4055_s8, 4  ;;  %s3322_s30 = int_to_ptr.vmem [resolvable:$true] %s3321_s30 }
 0x2fb   :  { %3776 = vmatprep.subr.bf16.mxu1 %v4000_v62  ;;  %3798 = vmatprep.subr.bf16.mxu0 %v4001_v63  ;;  %s4030_s10 = scalar_lea.vmem %s3322_s30, 128  ;;  %p4035_p1 = scmp.lt.s32.totalorder %s3322_s30, %s3322_s30 }
 0x2fc   :  { %p4031_p0 = scmp.ne.s32.totalorder %s3322_s30, %s4030_s10  ;;  %p4036_p2 = scmp.lt.s32.totalorder %s4030_s10, %s4030_s10 }
 0x2fe   :  { %3777 = vmatpush3.bf16.msra.mxu1 %v4002_v0  ;;  %3799 = vmatpush3.bf16.msra.mxu0 %v4003_v1  ;;  %p4037_p3 = por %p4036_p2, %p4035_p1 }
 0x2ff   :  { %3778 = vmatprep.subr.bf16.mxu1 %v4004_v2  ;;  %3800 = vmatprep.subr.bf16.mxu0 %v4005_v3 }
 0x300   :  { %p4038_p4 = pnand %p4037_p3, %p4031_p0 }
 0x302   :  { %3779 = vmatpush3.bf16.msra.mxu1 %v4006_v4  ;;  %3801 = vmatpush3.bf16.msra.mxu0 %v4007_v39 }
 0x303   :  { %3780 = vmatprep.subr.bf16.mxu1 %v4008_v5  ;;  %3802 = vmatprep.subr.bf16.mxu0 %v4009_v6 }
 0x306   :  { %3781 = vmatpush3.bf16.msra.mxu1 %v4010_v7  ;;  %3803 = vmatpush3.bf16.msra.mxu0 %v4011_v14 }
 0x307   :  { %3782 = vmatprep.subr.bf16.mxu1 %v4012_v8  ;;  %3804 = vmatprep.subr.bf16.mxu0 %v4013_v21 }
 0x30a   :  { %3783 = vmatpush3.bf16.msra.mxu1 %v4014_v9  ;;  %3805 = vmatpush3.bf16.msra.mxu0 %v4015_v51 }
 0x30b   :  { %3784 = vmatprep.subr.bf16.mxu1 %v4016_v10  ;;  %3806 = vmatprep.subr.bf16.mxu0 %v4017_v11 }
 0x30e   :  { %3785 = vmatpush3.bf16.msra.mxu1 %v4018_v13  ;;  %3807 = vmatpush3.bf16.msra.mxu0 %v4019_v15 }
 0x30f   :  { %3786 = vmatprep.subr.bf16.mxu1 %v4020_v16  ;;  %3808 = vmatprep.subr.bf16.mxu0 %v4021_v17 }
 0x312   :  { %3787 = vmatpush3.bf16.msra.mxu1 %v4022_v18  ;;  %3809 = vmatpush3.bf16.msra.mxu0 %v4023_v19 }
 0x313   :  { %3788 = vmatprep.subr.bf16.mxu1 %v4024_v57  ;;  %3810 = vmatprep.subr.bf16.mxu0 %v4025_v20 }
 0x316   :  { %3789 = vmatpush3.bf16.msra.mxu1 %v4026_v22  ;;  %3811 = vmatpush3.bf16.msra.mxu0 %v4027_v23 }
 0x36f   :  { %v2513_v36 = vpop.f32.mrb[8].mxu1 }
 0x370   :  { %v3822_v37 = vadd.f32 %v2513_v36, %v973_v32  ;;  %v2595_v38 = vpop.f32.mrb[12].mxu0  ;;  %v2515_v40 = vpop.f32.mrb[9].mxu1 }
 0x371   :  { %v3824_v41 = vadd.f32 %v2595_v38, %v981_v33  ;;  %v3823_v42 = vadd.f32 %v2515_v40, %v977_v34  ;;  %v2597_v43 = vpop.f32.mrb[13].mxu0  ;;  %v2517_v44 = vpop.f32.mrb[10].mxu1 }
 0x372   :  { %vm2606_vm10 = vcmp.gt.f32.partialorder %v3822_v37, 0.0  ;;  %v2614_v28 = vmul.f32 0.2, %v3822_v37  ;;  %v3825_v45 = vadd.f32 %v2597_v43, %v985_v35  ;;  %v2599_v27 = vpop.f32.mrb[14].mxu0  ;;  %v2518_v46 = vpop.f32.mrb[11].mxu1 }
 0x373   :  { %vm2608_vm11 = vcmp.gt.f32.partialorder %v3824_v41, 0.0  ;;  %v2616_v58 = vmul.f32 0.2, %v3824_v41  ;;  %vm2607_vm12 = vcmp.gt.f32.partialorder %v3823_v42, 0.0  ;;  %v2615_v30 = vmul.f32 0.2, %v3823_v42 }
 0x374   :  { %v2622_v47 = vsel %vm2606_vm10, %v3822_v37, %v2614_v28  ;;  %vm2609_vm13 = vcmp.gt.f32.partialorder %v3825_v45, 0.0  ;;  %v2617_v31 = vmul.f32 0.2, %v3825_v45  ;;  %v2600_v48 = vpop.f32.mrb[15].mxu0 }
 0x375   :  { %v2624_v52 = vsel %vm2608_vm11, %v3824_v41, %v2616_v58  ;;  %v2623_v49 = vsel %vm2607_vm12, %v3823_v42, %v2615_v30  ;;  %v2630_v54 = vpack.c.bf16 %v2622_v47, %v2622_v47 }
 0x376   :  { %v2631_v50 = vpack.c.bf16 %v2623_v49, %v2623_v49  ;;  %v2625_v53 = vsel %vm2609_vm13, %v3825_v45, %v2617_v31  ;;  %v2632_v12 = vpack.c.bf16 %v2624_v52, %v2624_v52 }
 0x377   :  { %v2633_v55 = vpack.c.bf16 %v2625_v53, %v2625_v53 }
 0x378   :  { %3265 = vmatprep.mubr.bf16.mxu1 %v2631_v50 }
 0x379   :  { %3305 = vmatprep.mubr.bf16.mxu0 %v2633_v55  ;;  %3266 = vmatmul.mubr.bf16.vlgmr.msra.gmra.mrb[16].mxu1 %v2630_v54 }
 0x37a   :  { %3306 = vmatmul.mubr.bf16.vlgmr.msra.gmra.mrb[20].mxu0 %v2632_v12 }
 0x3cc   :  { %v3746_v56 = vpop.f32.mrb[12].mxu1  ;;  %v3768_v59 = vpop.f32.mrb[16].mxu0 }
 0x3cd   :  { %v3747_v61 = vpop.f32.mrb[13].mxu1  ;;  %v3769_v62 = vpop.f32.mrb[17].mxu0 }
 0x3ce   :  { %v3748_v63 = vadd.f32 %v3747_v61, %v3746_v56  ;;  %v3770_v0 = vadd.f32 %v3769_v62, %v3768_v59  ;;  %v3749_v1 = vpop.f32.mrb[14].mxu1  ;;  %v3771_v2 = vpop.f32.mrb[18].mxu0 }
 0x3cf   :  { %v3750_v3 = vpop.f32.mrb[15].mxu1  ;;  %v3772_v4 = vpop.f32.mrb[19].mxu0 }
 0x3d0   :  { %v3188_v39 = vadd.f32 %v3748_v63, %v3665_v60 }
 0x3d2   :  { %v3228_v5 = vadd.f32 %v3770_v0, %v3188_v39 }
 0x44c   :  { %v3790_v6 = vpop.f32.mrb[16].mxu1 }
 0x44d   :  { %v3812_v7 = vpop.f32.mrb[20].mxu0  ;;  %v3791_v14 = vpop.f32.mrb[17].mxu1 }
 0x44e   :  { %v3792_v8 = vadd.f32 %v3791_v14, %v3790_v6  ;;  %v3813_v21 = vpop.f32.mrb[21].mxu0  ;;  %v3793_v9 = vpop.f32.mrb[18].mxu1 }
 0x44f   :  { %v3814_v51 = vadd.f32 %v3813_v21, %v3812_v7  ;;  %v3815_v10 = vpop.f32.mrb[22].mxu0  ;;  %v3794_v11 = vpop.f32.mrb[19].mxu1 }
 0x450   :  { %v3268_v13 = vadd.f32 %v3792_v8, %v3228_v5  ;;  %v3816_v15 = vpop.f32.mrb[23].mxu0 }
 0x452   :  { %v3308_v16 = vadd.f32 %v3814_v51, %v3268_v13 }
 0x454   :  { %4028 = vtanh.f32 %v3308_v16 }
 0x45e   :  { %v4029_v17 = vpop.eup %4028 }
 0x45f   :  { %3314 = vst [vmem:[#allocation2] sm:$0xff] %v4029_v17 }
 0x460   :  { %4041 = shalt.err (!%p4038_p4)
}
 0x461   :  { %s4042_s12 = scalar_lea.hbm %s5413_s9, 128 }
 0x462   :  { %p4043_p5 = scmp.ne.s32.totalorder %s5413_s9, %s4042_s12  ;;  %p4046_p6 = scmp.lt.u32.totalorder %s4042_s12, %s5413_s9 }
 0x464   :  { %p4048_p7 = pnand %p4046_p6, %p4043_p5 }
 0x466   :  { %4051 = shalt.err (!%p4048_p7)
}
 0x467   :  { %3324 = dma.vmem_to_hbm [thread:$0]  %s3322_s30, 128, %s5413_s9, [#allocation3]  }
 0x468   :  { %4052 = dma.done.wait [#allocation3], 128  }
 0x469   :  { %4053 = vsyncadd [#allocation3], 4294967168 }
 0x46a   :  { %3328 = vsyncpa [#allocation3], 1 }

</bundles_post_ra>
